<compile_context>
chip_gen: v5e
topology: v5e:2x2
jax: 0.10.0
libtpu: 0.0.40
codegen_flags: <defaults>
</compile_context>

<pallas_src>
import numpy as np
import jax
import jax.numpy as jnp
from jax.experimental import pallas as pl
from jax.experimental.pallas import tpu as pltpu

d_k = 32
d_v = 32
d_model = 256
n_head = 8
d_ff = 32

_LN_EPS = 1.0e-5


# ------------------------------ fused kernel -------------------------------

def _encoder_layer_kernel(x_ref, mask_ref,
                          wqkv_ref, bqkv_ref,
                          wo_ref, bo_ref, gamma_ref, beta_ref,
                          w1_ref, b1_ref, w2_ref, b2_ref,
                          out_ref, attn_ref):
    # One batch element per grid step; all heads handled here.
    x = x_ref[0]                       # (S, d_model)  -- also the residual
    mask = mask_ref[0] != 0            # (S, S) bool, hoisted out of head loop

    # ---- fused QKV projection: one MXU pass, N = 3*H*d_k = 768 ----
    qkv = (jnp.dot(x, wqkv_ref[...], preferred_element_type=jnp.float32)
           + bqkv_ref[...])            # (S, 768)

    # fold 1/sqrt(d_k) into Q once (instead of scaling every (S,S) score tile)
    scale = jnp.float32(1.0 / np.sqrt(d_k))
    q_all = qkv[:, 0:n_head * d_k] * scale
    k_all = qkv[:, n_head * d_k:2 * n_head * d_k]
    v_all = qkv[:, 2 * n_head * d_k:3 * n_head * d_k]

    # ---- scaled dot-product attention, all heads in this grid step ----
    ctx_parts = []
    for h in range(n_head):            # unrolled at trace time
        q_h = q_all[:, h * d_k:(h + 1) * d_k]          # (S, d_k)
        k_h = k_all[:, h * d_k:(h + 1) * d_k]          # (S, d_k)
        v_h = v_all[:, h * d_v:(h + 1) * d_v]          # (S, d_v)

        s_h = jnp.dot(q_h, k_h.T, preferred_element_type=jnp.float32)
        s_h = jnp.where(mask, jnp.float32(-1.0e9), s_h)

        m_h = jnp.max(s_h, axis=-1, keepdims=True)
        e_h = jnp.exp(s_h - m_h)
        denom = jnp.sum(e_h, axis=-1, keepdims=True)
        a_h = e_h * pl.reciprocal(denom, approx=True)  # EUP slot, ~free

        attn_ref[0, h] = a_h
        ctx_parts.append(jnp.dot(a_h, v_h, preferred_element_type=jnp.float32))

    ctx = jnp.concatenate(ctx_parts, axis=-1)          # (S, H*d_v) = (S, 256)

    # ---- output projection + residual + LayerNorm (f32) ----
    y = (jnp.dot(ctx, wo_ref[...], preferred_element_type=jnp.float32)
         + bo_ref[...] + x)
    mean = jnp.mean(y, axis=-1, keepdims=True)
    var = jnp.mean((y - mean) ** 2, axis=-1, keepdims=True)
    yn = (y - mean) * jax.lax.rsqrt(var + _LN_EPS)
    yn = yn * gamma_ref[...] + beta_ref[...]

    # ---- position-wise FFN: fc2(relu(fc1(x))) ----
    h1 = (jnp.dot(yn, w1_ref[...], preferred_element_type=jnp.float32)
          + b1_ref[...])
    h1 = jnp.maximum(h1, jnp.float32(0.0))
    out = (jnp.dot(h1, w2_ref[...], preferred_element_type=jnp.float32)
           + b2_ref[...])
    out_ref[0] = out


# ------------------------------ JAX wrapper --------------------------------

@jax.jit
def encoder_layer(params, enc_inputs, enc_self_attn_mask):
    """enc_inputs: (B, S, d_model) f32; enc_self_attn_mask: (B, S, S) bool."""
    B, S, _ = enc_inputs.shape
    mask_i32 = enc_self_attn_mask.astype(jnp.int32)

    # advisory cost estimate for XLA scheduling
    flops = (2 * B * S * d_model * (3 * n_head * d_k)        # QKV proj
             + 2 * B * n_head * S * S * d_k * 2              # scores + attn@V
             + 2 * B * S * (n_head * d_v) * d_model          # out proj
             + 2 * B * S * d_model * d_ff * 2)               # FFN fc1 + fc2
    transcendentals = B * n_head * S * S + B * n_head * S + B * S
    weight_elems = (d_model * 3 * n_head * d_k + 3 * n_head * d_k
                    + n_head * d_v * d_model + 3 * d_model
                    + d_model * d_ff + d_ff + d_ff * d_model + d_model)
    bytes_accessed = 4 * (2 * B * S * d_model + B * S * S
                          + B * n_head * S * S + weight_elems)

    out, attn = pl.pallas_call(
        _encoder_layer_kernel,
        grid=(B,),
        in_specs=[
            pl.BlockSpec((1, S, d_model), lambda b: (b, 0, 0)),
            pl.BlockSpec((1, S, S), lambda b: (b, 0, 0)),
            pl.BlockSpec((d_model, 3 * n_head * d_k), lambda b: (0, 0)),
            pl.BlockSpec((1, 3 * n_head * d_k), lambda b: (0, 0)),
            pl.BlockSpec((n_head * d_v, d_model), lambda b: (0, 0)),
            pl.BlockSpec((1, d_model), lambda b: (0, 0)),
            pl.BlockSpec((1, d_model), lambda b: (0, 0)),
            pl.BlockSpec((1, d_model), lambda b: (0, 0)),
            pl.BlockSpec((d_model, d_ff), lambda b: (0, 0)),
            pl.BlockSpec((1, d_ff), lambda b: (0, 0)),
            pl.BlockSpec((d_ff, d_model), lambda b: (0, 0)),
            pl.BlockSpec((1, d_model), lambda b: (0, 0)),
        ],
        out_specs=[
            pl.BlockSpec((1, S, d_model), lambda b: (b, 0, 0)),
            pl.BlockSpec((1, n_head, S, S), lambda b: (b, 0, 0, 0)),
        ],
        out_shape=[
            jax.ShapeDtypeStruct((B, S, d_model), jnp.float32),
            jax.ShapeDtypeStruct((B, n_head, S, S), jnp.float32),
        ],
        compiler_params=pltpu.CompilerParams(
            dimension_semantics=("parallel",),
            vmem_limit_bytes=32 * 1024 * 1024,
        ),
        cost_estimate=pl.CostEstimate(
            flops=flops,
            transcendentals=transcendentals,
            bytes_accessed=bytes_accessed,
        ),
    )(enc_inputs, mask_i32,
      params["wqkv"], params["bqkv"],
      params["wo"], params["bo"], params["gamma"], params["beta"],
      params["w1"], params["b1"], params["w2"], params["b2"])
    return out, attn


# ------------------------------ params & reference --------------------------

def init_params(key):
    ks = jax.random.split(key, 14)
    scale = 0.02

    def lin(kw, kb, din, dout):
        w = scale * jax.random.normal(kw, (din, dout), jnp.float32)
        b = scale * jax.random.normal(kb, (1, dout), jnp.float32)
        return w, b

    wq, bq = lin(ks[0], ks[1], d_model, d_k * n_head)
    wk, bk = lin(ks[2], ks[3], d_model, d_k * n_head)
    wv, bv = lin(ks[4], ks[5], d_model, d_v * n_head)
    wo, bo = lin(ks[6], ks[7], n_head * d_v, d_model)
    w1, b1 = lin(ks[8], ks[9], d_model, d_ff)
    w2, b2 = lin(ks[10], ks[11], d_ff, d_model)
    gamma = 1.0 + 0.1 * jax.random.normal(ks[12], (1, d_model), jnp.float32)
    beta = 0.1 * jax.random.normal(ks[13], (1, d_model), jnp.float32)
    return dict(
        wqkv=jnp.concatenate([wq, wk, wv], axis=1),
        bqkv=jnp.concatenate([bq, bk, bv], axis=1),
        wo=wo, bo=bo, gamma=gamma, beta=beta,
        w1=w1, b1=b1, w2=w2, b2=b2,
    )


def reference(params, x, attn_mask):
    B, S, _ = x.shape
    hk = n_head * d_k
    wq, wk, wv = (params["wqkv"][:, :hk], params["wqkv"][:, hk:2 * hk],
                  params["wqkv"][:, 2 * hk:])
    bq, bk, bv = (params["bqkv"][:, :hk], params["bqkv"][:, hk:2 * hk],
                  params["bqkv"][:, 2 * hk:])
    q = (x @ wq + bq).reshape(B, S, n_head, d_k).transpose(0, 2, 1, 3)
    k = (x @ wk + bk).reshape(B, S, n_head, d_k).transpose(0, 2, 1, 3)
    v = (x @ wv + bv).reshape(B, S, n_head, d_v).transpose(0, 2, 1, 3)
    scores = jnp.einsum("bhqd,bhkd->bhqk", q, k) / np.sqrt(d_k)
    scores = jnp.where(attn_mask[:, None, :, :], -1.0e9, scores)
    attn = jax.nn.softmax(scores, axis=-1)
    ctx = jnp.einsum("bhqk,bhkd->bhqd", attn, v)
    ctx = ctx.transpose(0, 2, 1, 3).reshape(B, S, n_head * d_v)
    out = ctx @ params["wo"] + params["bo"] + x
    mean = out.mean(-1, keepdims=True)
    var = ((out - mean) ** 2).mean(-1, keepdims=True)
    out = (out - mean) * jax.lax.rsqrt(var + _LN_EPS)
    out = out * params["gamma"] + params["beta"]
    ff = jnp.maximum(out @ params["w1"] + params["b1"], 0.0)
    out = ff @ params["w2"] + params["b2"]
    return out, attn


# ----------------------------------- main -----------------------------------

if __name__ == "__main__":
    key = jax.random.PRNGKey(0)
    kp, kx = jax.random.split(key, 2)

    B, S = 2, 8
    params = init_params(kp)
    enc_inputs = jax.random.normal(kx, (B, S, d_model), jnp.float32)
    # causal-style mask: True above the diagonal -> masked out
    enc_self_attn_mask = jnp.triu(jnp.ones((S, S), jnp.bool_), k=1)[None].repeat(B, axis=0)

    enc_out, attn_map = encoder_layer(params, enc_inputs, enc_self_attn_mask)
    jax.block_until_ready(enc_out)
    jax.block_until_ready(attn_map)

    ref_out, ref_attn = reference(params, enc_inputs, enc_self_attn_mask)
    # tolerance slightly loosened for the EUP approx-reciprocal softmax
    assert np.allclose(np.asarray(enc_out), np.asarray(ref_out), atol=2e-3, rtol=2e-3)
    assert np.allclose(np.asarray(attn_map), np.asarray(ref_attn), atol=2e-3, rtol=2e-3)

    print("KERNEL_OK")
</pallas_src>

<mosaic_0001>
module attributes {stable_mosaic.version = 11 : i64} {
  func.func @_encoder_layer_kernel(%arg0: i32, %arg1: memref<1x8x256xf32, #tpu.memory_space<vmem>>, %arg2: memref<1x8x8xi32, #tpu.memory_space<vmem>>, %arg3: memref<256x768xf32, #tpu.memory_space<vmem>>, %arg4: memref<1x768xf32, #tpu.memory_space<vmem>>, %arg5: memref<256x256xf32, #tpu.memory_space<vmem>>, %arg6: memref<1x256xf32, #tpu.memory_space<vmem>>, %arg7: memref<1x256xf32, #tpu.memory_space<vmem>>, %arg8: memref<1x256xf32, #tpu.memory_space<vmem>>, %arg9: memref<256x32xf32, #tpu.memory_space<vmem>>, %arg10: memref<1x32xf32, #tpu.memory_space<vmem>>, %arg11: memref<32x256xf32, #tpu.memory_space<vmem>>, %arg12: memref<1x256xf32, #tpu.memory_space<vmem>>, %arg13: memref<1x8x256xf32, #tpu.memory_space<vmem>>, %arg14: memref<1x8x8x8xf32, #tpu.memory_space<vmem>>) attributes {dimension_semantics = [#tpu.dimension_semantics<parallel>], iteration_bounds = array<i64: 2>, scalar_prefetch = 0 : i64, scratch_operands = 0 : i64, tpu.core_type = #tpu.core_type<tc>, window_params = [{transform_indices = @transform_0, window_bounds = array<i64: 1, 8, 256>}, {transform_indices = @transform_1, window_bounds = array<i64: 1, 8, 8>}, {pipeline_mode = #tpu.pipeline_mode<synchronous>, transform_indices = @transform_2, window_bounds = array<i64: 256, 768>}, {pipeline_mode = #tpu.pipeline_mode<synchronous>, transform_indices = @transform_3, window_bounds = array<i64: 1, 768>}, {pipeline_mode = #tpu.pipeline_mode<synchronous>, transform_indices = @transform_4, window_bounds = array<i64: 256, 256>}, {pipeline_mode = #tpu.pipeline_mode<synchronous>, transform_indices = @transform_5, window_bounds = array<i64: 1, 256>}, {pipeline_mode = #tpu.pipeline_mode<synchronous>, transform_indices = @transform_6, window_bounds = array<i64: 1, 256>}, {pipeline_mode = #tpu.pipeline_mode<synchronous>, transform_indices = @transform_7, window_bounds = array<i64: 1, 256>}, {pipeline_mode = #tpu.pipeline_mode<synchronous>, transform_indices = @transform_8, window_bounds = array<i64: 256, 32>}, {pipeline_mode = #tpu.pipeline_mode<synchronous>, transform_indices = @transform_9, window_bounds = array<i64: 1, 32>}, {pipeline_mode = #tpu.pipeline_mode<synchronous>, transform_indices = @transform_10, window_bounds = array<i64: 32, 256>}, {pipeline_mode = #tpu.pipeline_mode<synchronous>, transform_indices = @transform_11, window_bounds = array<i64: 1, 256>}, {transform_indices = @transform_12, window_bounds = array<i64: 1, 8, 256>}, {transform_indices = @transform_13, window_bounds = array<i64: 1, 8, 8, 8>}]} {
    %c0 = arith.constant 0 : index
    %c0_0 = arith.constant 0 : index
    %c0_1 = arith.constant 0 : index
    %0 = vector.load %arg1[%c0, %c0_0, %c0_1] : memref<1x8x256xf32, #tpu.memory_space<vmem>>, vector<1x8x256xf32>
    %1 = vector.shape_cast %0 : vector<1x8x256xf32> to vector<8x256xf32>
    %c0_2 = arith.constant 0 : index
    %c0_3 = arith.constant 0 : index
    %c0_4 = arith.constant 0 : index
    %2 = vector.load %arg2[%c0_2, %c0_3, %c0_4] : memref<1x8x8xi32, #tpu.memory_space<vmem>>, vector<1x8x8xi32>
    %3 = vector.shape_cast %2 : vector<1x8x8xi32> to vector<8x8xi32>
    %c0_i32 = arith.constant 0 : i32
    %4 = vector.broadcast %c0_i32 : i32 to vector<8x8xi32>
    %5 = arith.cmpi ne, %3, %4 : vector<8x8xi32>
    %c0_5 = arith.constant 0 : index
    %c0_6 = arith.constant 0 : index
    %6 = vector.load %arg3[%c0_5, %c0_6] : memref<256x768xf32, #tpu.memory_space<vmem>>, vector<256x768xf32>
    %cst = arith.constant dense<0.000000e+00> : vector<8x768xf32>
    %7 = tpu.matmul %1, %6, %cst {dimension_numbers = #tpu.dot_dimension_numbers<[1], [0], [0], [1], [0, 0, 1, 1], [], []>} : vector<8x256xf32>, vector<256x768xf32>, vector<8x768xf32> -> vector<8x768xf32>
    %c0_7 = arith.constant 0 : index
    %c0_8 = arith.constant 0 : index
    %8 = vector.load %arg4[%c0_7, %c0_8] : memref<1x768xf32, #tpu.memory_space<vmem>>, vector<1x768xf32>
    %9 = vector.broadcast %8 : vector<1x768xf32> to vector<8x768xf32>
    %10 = arith.addf %7, %9 : vector<8x768xf32>
    %11 = vector.extract_strided_slice %10 {offsets = [0, 0], sizes = [8, 256], strides = [1, 1]} : vector<8x768xf32> to vector<8x256xf32>
    %cst_9 = arith.constant 0.176776692 : f32
    %12 = vector.broadcast %cst_9 : f32 to vector<8x256xf32>
    %13 = arith.mulf %11, %12 : vector<8x256xf32>
    %14 = vector.extract_strided_slice %10 {offsets = [0, 256], sizes = [8, 256], strides = [1, 1]} : vector<8x768xf32> to vector<8x256xf32>
    %15 = vector.extract_strided_slice %10 {offsets = [0, 512], sizes = [8, 256], strides = [1, 1]} : vector<8x768xf32> to vector<8x256xf32>
    %16 = vector.extract_strided_slice %13 {offsets = [0, 0], sizes = [8, 32], strides = [1, 1]} : vector<8x256xf32> to vector<8x32xf32>
    %17 = vector.extract_strided_slice %14 {offsets = [0, 0], sizes = [8, 32], strides = [1, 1]} : vector<8x256xf32> to vector<8x32xf32>
    %18 = vector.extract_strided_slice %15 {offsets = [0, 0], sizes = [8, 32], strides = [1, 1]} : vector<8x256xf32> to vector<8x32xf32>
    %19 = tpu.transpose %17, [1, 0] : vector<8x32xf32> -> vector<32x8xf32>
    %cst_10 = arith.constant dense<0.000000e+00> : vector<8x8xf32>
    %20 = tpu.matmul %16, %19, %cst_10 {dimension_numbers = #tpu.dot_dimension_numbers<[1], [0], [0], [1], [0, 0, 1, 1], [], []>} : vector<8x32xf32>, vector<32x8xf32>, vector<8x8xf32> -> vector<8x8xf32>
    %cst_11 = arith.constant -1.000000e+09 : f32
    %21 = vector.broadcast %cst_11 : f32 to vector<8x8xf32>
    %22 = arith.select %5, %21, %20 : vector<8x8xi1>, vector<8x8xf32>
    %cst_12 = arith.constant dense<0xFF800000> : vector<8xf32>
    %23 = vector.multi_reduction <maximumf>, %22, %cst_12 [1] : vector<8x8xf32> to vector<8xf32>
    %24 = vector.shape_cast %23 : vector<8xf32> to vector<8x1xf32>
    %25 = vector.broadcast %24 : vector<8x1xf32> to vector<8x8xf32>
    %26 = arith.subf %22, %25 : vector<8x8xf32>
    %27 = math.exp %26 : vector<8x8xf32>
    %cst_13 = arith.constant dense<0.000000e+00> : vector<8xf32>
    %28 = vector.multi_reduction <add>, %27, %cst_13 [1] : vector<8x8xf32> to vector<8xf32>
    %29 = vector.shape_cast %28 : vector<8xf32> to vector<8x1xf32>
    %30 = tpu.reciprocal %29 {approx = true} : vector<8x1xf32> -> vector<8x1xf32>
    %31 = vector.broadcast %30 : vector<8x1xf32> to vector<8x8xf32>
    %32 = arith.mulf %27, %31 : vector<8x8xf32>
    %c0_14 = arith.constant 0 : index
    %c0_15 = arith.constant 0 : index
    %c0_16 = arith.constant 0 : index
    %c0_17 = arith.constant 0 : index
    %33 = vector.load %arg14[%c0_14, %c0_15, %c0_16, %c0_17] : memref<1x8x8x8xf32, #tpu.memory_space<vmem>>, vector<1x1x8x8xf32>
    %34 = vector.shape_cast %33 : vector<1x1x8x8xf32> to vector<8x8xf32>
    %35 = vector.shape_cast %32 : vector<8x8xf32> to vector<1x1x8x8xf32>
    tpu.vector_store %arg14[%c0_14, %c0_15, %c0_16, %c0_17], %35 {strides = array<i32>} : memref<1x8x8x8xf32, #tpu.memory_space<vmem>>, vector<1x1x8x8xf32>,
    %cst_18 = arith.constant dense<0.000000e+00> : vector<8x32xf32>
    %36 = tpu.matmul %32, %18, %cst_18 {dimension_numbers = #tpu.dot_dimension_numbers<[1], [0], [0], [1], [0, 0, 1, 1], [], []>} : vector<8x8xf32>, vector<8x32xf32>, vector<8x32xf32> -> vector<8x32xf32>
    %37 = vector.extract_strided_slice %13 {offsets = [0, 32], sizes = [8, 32], strides = [1, 1]} : vector<8x256xf32> to vector<8x32xf32>
    %38 = vector.extract_strided_slice %14 {offsets = [0, 32], sizes = [8, 32], strides = [1, 1]} : vector<8x256xf32> to vector<8x32xf32>
    %39 = vector.extract_strided_slice %15 {offsets = [0, 32], sizes = [8, 32], strides = [1, 1]} : vector<8x256xf32> to vector<8x32xf32>
    %40 = tpu.transpose %38, [1, 0] : vector<8x32xf32> -> vector<32x8xf32>
    %cst_19 = arith.constant dense<0.000000e+00> : vector<8x8xf32>
    %41 = tpu.matmul %37, %40, %cst_19 {dimension_numbers = #tpu.dot_dimension_numbers<[1], [0], [0], [1], [0, 0, 1, 1], [], []>} : vector<8x32xf32>, vector<32x8xf32>, vector<8x8xf32> -> vector<8x8xf32>
    %cst_20 = arith.constant -1.000000e+09 : f32
    %42 = vector.broadcast %cst_20 : f32 to vector<8x8xf32>
    %43 = arith.select %5, %42, %41 : vector<8x8xi1>, vector<8x8xf32>
    %cst_21 = arith.constant dense<0xFF800000> : vector<8xf32>
    %44 = vector.multi_reduction <maximumf>, %43, %cst_21 [1] : vector<8x8xf32> to vector<8xf32>
    %45 = vector.shape_cast %44 : vector<8xf32> to vector<8x1xf32>
    %46 = vector.broadcast %45 : vector<8x1xf32> to vector<8x8xf32>
    %47 = arith.subf %43, %46 : vector<8x8xf32>
    %48 = math.exp %47 : vector<8x8xf32>
    %cst_22 = arith.constant dense<0.000000e+00> : vector<8xf32>
    %49 = vector.multi_reduction <add>, %48, %cst_22 [1] : vector<8x8xf32> to vector<8xf32>
    %50 = vector.shape_cast %49 : vector<8xf32> to vector<8x1xf32>
    %51 = tpu.reciprocal %50 {approx = true} : vector<8x1xf32> -> vector<8x1xf32>
    %52 = vector.broadcast %51 : vector<8x1xf32> to vector<8x8xf32>
    %53 = arith.mulf %48, %52 : vector<8x8xf32>
    %c0_23 = arith.constant 0 : index
    %c1 = arith.constant 1 : index
    %c0_24 = arith.constant 0 : index
    %c0_25 = arith.constant 0 : index
    %54 = vector.load %arg14[%c0_23, %c1, %c0_24, %c0_25] : memref<1x8x8x8xf32, #tpu.memory_space<vmem>>, vector<1x1x8x8xf32>
    %55 = vector.shape_cast %54 : vector<1x1x8x8xf32> to vector<8x8xf32>
    %56 = vector.shape_cast %53 : vector<8x8xf32> to vector<1x1x8x8xf32>
    tpu.vector_store %arg14[%c0_23, %c1, %c0_24, %c0_25], %56 {strides = array<i32>} : memref<1x8x8x8xf32, #tpu.memory_space<vmem>>, vector<1x1x8x8xf32>,
    %cst_26 = arith.constant dense<0.000000e+00> : vector<8x32xf32>
    %57 = tpu.matmul %53, %39, %cst_26 {dimension_numbers = #tpu.dot_dimension_numbers<[1], [0], [0], [1], [0, 0, 1, 1], [], []>} : vector<8x8xf32>, vector<8x32xf32>, vector<8x32xf32> -> vector<8x32xf32>
    %58 = vector.extract_strided_slice %13 {offsets = [0, 64], sizes = [8, 32], strides = [1, 1]} : vector<8x256xf32> to vector<8x32xf32>
    %59 = vector.extract_strided_slice %14 {offsets = [0, 64], sizes = [8, 32], strides = [1, 1]} : vector<8x256xf32> to vector<8x32xf32>
    %60 = vector.extract_strided_slice %15 {offsets = [0, 64], sizes = [8, 32], strides = [1, 1]} : vector<8x256xf32> to vector<8x32xf32>
    %61 = tpu.transpose %59, [1, 0] : vector<8x32xf32> -> vector<32x8xf32>
    %cst_27 = arith.constant dense<0.000000e+00> : vector<8x8xf32>
    %62 = tpu.matmul %58, %61, %cst_27 {dimension_numbers = #tpu.dot_dimension_numbers<[1], [0], [0], [1], [0, 0, 1, 1], [], []>} : vector<8x32xf32>, vector<32x8xf32>, vector<8x8xf32> -> vector<8x8xf32>
    %cst_28 = arith.constant -1.000000e+09 : f32
    %63 = vector.broadcast %cst_28 : f32 to vector<8x8xf32>
    %64 = arith.select %5, %63, %62 : vector<8x8xi1>, vector<8x8xf32>
    %cst_29 = arith.constant dense<0xFF800000> : vector<8xf32>
    %65 = vector.multi_reduction <maximumf>, %64, %cst_29 [1] : vector<8x8xf32> to vector<8xf32>
    %66 = vector.shape_cast %65 : vector<8xf32> to vector<8x1xf32>
    %67 = vector.broadcast %66 : vector<8x1xf32> to vector<8x8xf32>
    %68 = arith.subf %64, %67 : vector<8x8xf32>
    %69 = math.exp %68 : vector<8x8xf32>
    %cst_30 = arith.constant dense<0.000000e+00> : vector<8xf32>
    %70 = vector.multi_reduction <add>, %69, %cst_30 [1] : vector<8x8xf32> to vector<8xf32>
    %71 = vector.shape_cast %70 : vector<8xf32> to vector<8x1xf32>
    %72 = tpu.reciprocal %71 {approx = true} : vector<8x1xf32> -> vector<8x1xf32>
    %73 = vector.broadcast %72 : vector<8x1xf32> to vector<8x8xf32>
    %74 = arith.mulf %69, %73 : vector<8x8xf32>
    %c0_31 = arith.constant 0 : index
    %c2 = arith.constant 2 : index
    %c0_32 = arith.constant 0 : index
    %c0_33 = arith.constant 0 : index
    %75 = vector.load %arg14[%c0_31, %c2, %c0_32, %c0_33] : memref<1x8x8x8xf32, #tpu.memory_space<vmem>>, vector<1x1x8x8xf32>
    %76 = vector.shape_cast %75 : vector<1x1x8x8xf32> to vector<8x8xf32>
    %77 = vector.shape_cast %74 : vector<8x8xf32> to vector<1x1x8x8xf32>
    tpu.vector_store %arg14[%c0_31, %c2, %c0_32, %c0_33], %77 {strides = array<i32>} : memref<1x8x8x8xf32, #tpu.memory_space<vmem>>, vector<1x1x8x8xf32>,
    %cst_34 = arith.constant dense<0.000000e+00> : vector<8x32xf32>
    %78 = tpu.matmul %74, %60, %cst_34 {dimension_numbers = #tpu.dot_dimension_numbers<[1], [0], [0], [1], [0, 0, 1, 1], [], []>} : vector<8x8xf32>, vector<8x32xf32>, vector<8x32xf32> -> vector<8x32xf32>
    %79 = vector.extract_strided_slice %13 {offsets = [0, 96], sizes = [8, 32], strides = [1, 1]} : vector<8x256xf32> to vector<8x32xf32>
    %80 = vector.extract_strided_slice %14 {offsets = [0, 96], sizes = [8, 32], strides = [1, 1]} : vector<8x256xf32> to vector<8x32xf32>
    %81 = vector.extract_strided_slice %15 {offsets = [0, 96], sizes = [8, 32], strides = [1, 1]} : vector<8x256xf32> to vector<8x32xf32>
    %82 = tpu.transpose %80, [1, 0] : vector<8x32xf32> -> vector<32x8xf32>
    %cst_35 = arith.constant dense<0.000000e+00> : vector<8x8xf32>
    %83 = tpu.matmul %79, %82, %cst_35 {dimension_numbers = #tpu.dot_dimension_numbers<[1], [0], [0], [1], [0, 0, 1, 1], [], []>} : vector<8x32xf32>, vector<32x8xf32>, vector<8x8xf32> -> vector<8x8xf32>
    %cst_36 = arith.constant -1.000000e+09 : f32
    %84 = vector.broadcast %cst_36 : f32 to vector<8x8xf32>
    %85 = arith.select %5, %84, %83 : vector<8x8xi1>, vector<8x8xf32>
    %cst_37 = arith.constant dense<0xFF800000> : vector<8xf32>
    %86 = vector.multi_reduction <maximumf>, %85, %cst_37 [1] : vector<8x8xf32> to vector<8xf32>
    %87 = vector.shape_cast %86 : vector<8xf32> to vector<8x1xf32>
    %88 = vector.broadcast %87 : vector<8x1xf32> to vector<8x8xf32>
    %89 = arith.subf %85, %88 : vector<8x8xf32>
    %90 = math.exp %89 : vector<8x8xf32>
    %cst_38 = arith.constant dense<0.000000e+00> : vector<8xf32>
    %91 = vector.multi_reduction <add>, %90, %cst_38 [1] : vector<8x8xf32> to vector<8xf32>
    %92 = vector.shape_cast %91 : vector<8xf32> to vector<8x1xf32>
    %93 = tpu.reciprocal %92 {approx = true} : vector<8x1xf32> -> vector<8x1xf32>
    %94 = vector.broadcast %93 : vector<8x1xf32> to vector<8x8xf32>
    %95 = arith.mulf %90, %94 : vector<8x8xf32>
    %c0_39 = arith.constant 0 : index
    %c3 = arith.constant 3 : index
    %c0_40 = arith.constant 0 : index
    %c0_41 = arith.constant 0 : index
    %96 = vector.load %arg14[%c0_39, %c3, %c0_40, %c0_41] : memref<1x8x8x8xf32, #tpu.memory_space<vmem>>, vector<1x1x8x8xf32>
    %97 = vector.shape_cast %96 : vector<1x1x8x8xf32> to vector<8x8xf32>
    %98 = vector.shape_cast %95 : vector<8x8xf32> to vector<1x1x8x8xf32>
    tpu.vector_store %arg14[%c0_39, %c3, %c0_40, %c0_41], %98 {strides = array<i32>} : memref<1x8x8x8xf32, #tpu.memory_space<vmem>>, vector<1x1x8x8xf32>,
    %cst_42 = arith.constant dense<0.000000e+00> : vector<8x32xf32>
    %99 = tpu.matmul %95, %81, %cst_42 {dimension_numbers = #tpu.dot_dimension_numbers<[1], [0], [0], [1], [0, 0, 1, 1], [], []>} : vector<8x8xf32>, vector<8x32xf32>, vector<8x32xf32> -> vector<8x32xf32>
    %100 = vector.extract_strided_slice %13 {offsets = [0, 128], sizes = [8, 32], strides = [1, 1]} : vector<8x256xf32> to vector<8x32xf32>
    %101 = vector.extract_strided_slice %14 {offsets = [0, 128], sizes = [8, 32], strides = [1, 1]} : vector<8x256xf32> to vector<8x32xf32>
    %102 = vector.extract_strided_slice %15 {offsets = [0, 128], sizes = [8, 32], strides = [1, 1]} : vector<8x256xf32> to vector<8x32xf32>
    %103 = tpu.transpose %101, [1, 0] : vector<8x32xf32> -> vector<32x8xf32>
    %cst_43 = arith.constant dense<0.000000e+00> : vector<8x8xf32>
    %104 = tpu.matmul %100, %103, %cst_43 {dimension_numbers = #tpu.dot_dimension_numbers<[1], [0], [0], [1], [0, 0, 1, 1], [], []>} : vector<8x32xf32>, vector<32x8xf32>, vector<8x8xf32> -> vector<8x8xf32>
    %cst_44 = arith.constant -1.000000e+09 : f32
    %105 = vector.broadcast %cst_44 : f32 to vector<8x8xf32>
    %106 = arith.select %5, %105, %104 : vector<8x8xi1>, vector<8x8xf32>
    %cst_45 = arith.constant dense<0xFF800000> : vector<8xf32>
    %107 = vector.multi_reduction <maximumf>, %106, %cst_45 [1] : vector<8x8xf32> to vector<8xf32>
    %108 = vector.shape_cast %107 : vector<8xf32> to vector<8x1xf32>
    %109 = vector.broadcast %108 : vector<8x1xf32> to vector<8x8xf32>
    %110 = arith.subf %106, %109 : vector<8x8xf32>
    %111 = math.exp %110 : vector<8x8xf32>
    %cst_46 = arith.constant dense<0.000000e+00> : vector<8xf32>
    %112 = vector.multi_reduction <add>, %111, %cst_46 [1] : vector<8x8xf32> to vector<8xf32>
    %113 = vector.shape_cast %112 : vector<8xf32> to vector<8x1xf32>
    %114 = tpu.reciprocal %113 {approx = true} : vector<8x1xf32> -> vector<8x1xf32>
    %115 = vector.broadcast %114 : vector<8x1xf32> to vector<8x8xf32>
    %116 = arith.mulf %111, %115 : vector<8x8xf32>
    %c0_47 = arith.constant 0 : index
    %c4 = arith.constant 4 : index
    %c0_48 = arith.constant 0 : index
    %c0_49 = arith.constant 0 : index
    %117 = vector.load %arg14[%c0_47, %c4, %c0_48, %c0_49] : memref<1x8x8x8xf32, #tpu.memory_space<vmem>>, vector<1x1x8x8xf32>
    %118 = vector.shape_cast %117 : vector<1x1x8x8xf32> to vector<8x8xf32>
    %119 = vector.shape_cast %116 : vector<8x8xf32> to vector<1x1x8x8xf32>
    tpu.vector_store %arg14[%c0_47, %c4, %c0_48, %c0_49], %119 {strides = array<i32>} : memref<1x8x8x8xf32, #tpu.memory_space<vmem>>, vector<1x1x8x8xf32>,
    %cst_50 = arith.constant dense<0.000000e+00> : vector<8x32xf32>
    %120 = tpu.matmul %116, %102, %cst_50 {dimension_numbers = #tpu.dot_dimension_numbers<[1], [0], [0], [1], [0, 0, 1, 1], [], []>} : vector<8x8xf32>, vector<8x32xf32>, vector<8x32xf32> -> vector<8x32xf32>
    %121 = vector.extract_strided_slice %13 {offsets = [0, 160], sizes = [8, 32], strides = [1, 1]} : vector<8x256xf32> to vector<8x32xf32>
    %122 = vector.extract_strided_slice %14 {offsets = [0, 160], sizes = [8, 32], strides = [1, 1]} : vector<8x256xf32> to vector<8x32xf32>
    %123 = vector.extract_strided_slice %15 {offsets = [0, 160], sizes = [8, 32], strides = [1, 1]} : vector<8x256xf32> to vector<8x32xf32>
    %124 = tpu.transpose %122, [1, 0] : vector<8x32xf32> -> vector<32x8xf32>
    %cst_51 = arith.constant dense<0.000000e+00> : vector<8x8xf32>
    %125 = tpu.matmul %121, %124, %cst_51 {dimension_numbers = #tpu.dot_dimension_numbers<[1], [0], [0], [1], [0, 0, 1, 1], [], []>} : vector<8x32xf32>, vector<32x8xf32>, vector<8x8xf32> -> vector<8x8xf32>
    %cst_52 = arith.constant -1.000000e+09 : f32
    %126 = vector.broadcast %cst_52 : f32 to vector<8x8xf32>
    %127 = arith.select %5, %126, %125 : vector<8x8xi1>, vector<8x8xf32>
    %cst_53 = arith.constant dense<0xFF800000> : vector<8xf32>
    %128 = vector.multi_reduction <maximumf>, %127, %cst_53 [1] : vector<8x8xf32> to vector<8xf32>
    %129 = vector.shape_cast %128 : vector<8xf32> to vector<8x1xf32>
    %130 = vector.broadcast %129 : vector<8x1xf32> to vector<8x8xf32>
    %131 = arith.subf %127, %130 : vector<8x8xf32>
    %132 = math.exp %131 : vector<8x8xf32>
    %cst_54 = arith.constant dense<0.000000e+00> : vector<8xf32>
    %133 = vector.multi_reduction <add>, %132, %cst_54 [1] : vector<8x8xf32> to vector<8xf32>
    %134 = vector.shape_cast %133 : vector<8xf32> to vector<8x1xf32>
    %135 = tpu.reciprocal %134 {approx = true} : vector<8x1xf32> -> vector<8x1xf32>
    %136 = vector.broadcast %135 : vector<8x1xf32> to vector<8x8xf32>
    %137 = arith.mulf %132, %136 : vector<8x8xf32>
    %c0_55 = arith.constant 0 : index
    %c5 = arith.constant 5 : index
    %c0_56 = arith.constant 0 : index
    %c0_57 = arith.constant 0 : index
    %138 = vector.load %arg14[%c0_55, %c5, %c0_56, %c0_57] : memref<1x8x8x8xf32, #tpu.memory_space<vmem>>, vector<1x1x8x8xf32>
    %139 = vector.shape_cast %138 : vector<1x1x8x8xf32> to vector<8x8xf32>
    %140 = vector.shape_cast %137 : vector<8x8xf32> to vector<1x1x8x8xf32>
    tpu.vector_store %arg14[%c0_55, %c5, %c0_56, %c0_57], %140 {strides = array<i32>} : memref<1x8x8x8xf32, #tpu.memory_space<vmem>>, vector<1x1x8x8xf32>,
    %cst_58 = arith.constant dense<0.000000e+00> : vector<8x32xf32>
    %141 = tpu.matmul %137, %123, %cst_58 {dimension_numbers = #tpu.dot_dimension_numbers<[1], [0], [0], [1], [0, 0, 1, 1], [], []>} : vector<8x8xf32>, vector<8x32xf32>, vector<8x32xf32> -> vector<8x32xf32>
    %142 = vector.extract_strided_slice %13 {offsets = [0, 192], sizes = [8, 32], strides = [1, 1]} : vector<8x256xf32> to vector<8x32xf32>
    %143 = vector.extract_strided_slice %14 {offsets = [0, 192], sizes = [8, 32], strides = [1, 1]} : vector<8x256xf32> to vector<8x32xf32>
    %144 = vector.extract_strided_slice %15 {offsets = [0, 192], sizes = [8, 32], strides = [1, 1]} : vector<8x256xf32> to vector<8x32xf32>
    %145 = tpu.transpose %143, [1, 0] : vector<8x32xf32> -> vector<32x8xf32>
    %cst_59 = arith.constant dense<0.000000e+00> : vector<8x8xf32>
    %146 = tpu.matmul %142, %145, %cst_59 {dimension_numbers = #tpu.dot_dimension_numbers<[1], [0], [0], [1], [0, 0, 1, 1], [], []>} : vector<8x32xf32>, vector<32x8xf32>, vector<8x8xf32> -> vector<8x8xf32>
    %cst_60 = arith.constant -1.000000e+09 : f32
    %147 = vector.broadcast %cst_60 : f32 to vector<8x8xf32>
    %148 = arith.select %5, %147, %146 : vector<8x8xi1>, vector<8x8xf32>
    %cst_61 = arith.constant dense<0xFF800000> : vector<8xf32>
    %149 = vector.multi_reduction <maximumf>, %148, %cst_61 [1] : vector<8x8xf32> to vector<8xf32>
    %150 = vector.shape_cast %149 : vector<8xf32> to vector<8x1xf32>
    %151 = vector.broadcast %150 : vector<8x1xf32> to vector<8x8xf32>
    %152 = arith.subf %148, %151 : vector<8x8xf32>
    %153 = math.exp %152 : vector<8x8xf32>
    %cst_62 = arith.constant dense<0.000000e+00> : vector<8xf32>
    %154 = vector.multi_reduction <add>, %153, %cst_62 [1] : vector<8x8xf32> to vector<8xf32>
    %155 = vector.shape_cast %154 : vector<8xf32> to vector<8x1xf32>
    %156 = tpu.reciprocal %155 {approx = true} : vector<8x1xf32> -> vector<8x1xf32>
    %157 = vector.broadcast %156 : vector<8x1xf32> to vector<8x8xf32>
    %158 = arith.mulf %153, %157 : vector<8x8xf32>
    %c0_63 = arith.constant 0 : index
    %c6 = arith.constant 6 : index
    %c0_64 = arith.constant 0 : index
    %c0_65 = arith.constant 0 : index
    %159 = vector.load %arg14[%c0_63, %c6, %c0_64, %c0_65] : memref<1x8x8x8xf32, #tpu.memory_space<vmem>>, vector<1x1x8x8xf32>
    %160 = vector.shape_cast %159 : vector<1x1x8x8xf32> to vector<8x8xf32>
    %161 = vector.shape_cast %158 : vector<8x8xf32> to vector<1x1x8x8xf32>
    tpu.vector_store %arg14[%c0_63, %c6, %c0_64, %c0_65], %161 {strides = array<i32>} : memref<1x8x8x8xf32, #tpu.memory_space<vmem>>, vector<1x1x8x8xf32>,
    %cst_66 = arith.constant dense<0.000000e+00> : vector<8x32xf32>
    %162 = tpu.matmul %158, %144, %cst_66 {dimension_numbers = #tpu.dot_dimension_numbers<[1], [0], [0], [1], [0, 0, 1, 1], [], []>} : vector<8x8xf32>, vector<8x32xf32>, vector<8x32xf32> -> vector<8x32xf32>
    %163 = vector.extract_strided_slice %13 {offsets = [0, 224], sizes = [8, 32], strides = [1, 1]} : vector<8x256xf32> to vector<8x32xf32>
    %164 = vector.extract_strided_slice %14 {offsets = [0, 224], sizes = [8, 32], strides = [1, 1]} : vector<8x256xf32> to vector<8x32xf32>
    %165 = vector.extract_strided_slice %15 {offsets = [0, 224], sizes = [8, 32], strides = [1, 1]} : vector<8x256xf32> to vector<8x32xf32>
    %166 = tpu.transpose %164, [1, 0] : vector<8x32xf32> -> vector<32x8xf32>
    %cst_67 = arith.constant dense<0.000000e+00> : vector<8x8xf32>
    %167 = tpu.matmul %163, %166, %cst_67 {dimension_numbers = #tpu.dot_dimension_numbers<[1], [0], [0], [1], [0, 0, 1, 1], [], []>} : vector<8x32xf32>, vector<32x8xf32>, vector<8x8xf32> -> vector<8x8xf32>
    %cst_68 = arith.constant -1.000000e+09 : f32
    %168 = vector.broadcast %cst_68 : f32 to vector<8x8xf32>
    %169 = arith.select %5, %168, %167 : vector<8x8xi1>, vector<8x8xf32>
    %cst_69 = arith.constant dense<0xFF800000> : vector<8xf32>
    %170 = vector.multi_reduction <maximumf>, %169, %cst_69 [1] : vector<8x8xf32> to vector<8xf32>
    %171 = vector.shape_cast %170 : vector<8xf32> to vector<8x1xf32>
    %172 = vector.broadcast %171 : vector<8x1xf32> to vector<8x8xf32>
    %173 = arith.subf %169, %172 : vector<8x8xf32>
    %174 = math.exp %173 : vector<8x8xf32>
    %cst_70 = arith.constant dense<0.000000e+00> : vector<8xf32>
    %175 = vector.multi_reduction <add>, %174, %cst_70 [1] : vector<8x8xf32> to vector<8xf32>
    %176 = vector.shape_cast %175 : vector<8xf32> to vector<8x1xf32>
    %177 = tpu.reciprocal %176 {approx = true} : vector<8x1xf32> -> vector<8x1xf32>
    %178 = vector.broadcast %177 : vector<8x1xf32> to vector<8x8xf32>
    %179 = arith.mulf %174, %178 : vector<8x8xf32>
    %c0_71 = arith.constant 0 : index
    %c7 = arith.constant 7 : index
    %c0_72 = arith.constant 0 : index
    %c0_73 = arith.constant 0 : index
    %180 = vector.load %arg14[%c0_71, %c7, %c0_72, %c0_73] : memref<1x8x8x8xf32, #tpu.memory_space<vmem>>, vector<1x1x8x8xf32>
    %181 = vector.shape_cast %180 : vector<1x1x8x8xf32> to vector<8x8xf32>
    %182 = vector.shape_cast %179 : vector<8x8xf32> to vector<1x1x8x8xf32>
    tpu.vector_store %arg14[%c0_71, %c7, %c0_72, %c0_73], %182 {strides = array<i32>} : memref<1x8x8x8xf32, #tpu.memory_space<vmem>>, vector<1x1x8x8xf32>,
    %cst_74 = arith.constant dense<0.000000e+00> : vector<8x32xf32>
    %183 = tpu.matmul %179, %165, %cst_74 {dimension_numbers = #tpu.dot_dimension_numbers<[1], [0], [0], [1], [0, 0, 1, 1], [], []>} : vector<8x8xf32>, vector<8x32xf32>, vector<8x32xf32> -> vector<8x32xf32>
    %184 = tpu.concatenate %36, %57, %78, %99, %120, %141, %162, %183 in 1 : vector<8x32xf32>, vector<8x32xf32>, vector<8x32xf32>, vector<8x32xf32>, vector<8x32xf32>, vector<8x32xf32>, vector<8x32xf32>, vector<8x32xf32> -> vector<8x256xf32>
    %c0_75 = arith.constant 0 : index
    %c0_76 = arith.constant 0 : index
    %185 = vector.load %arg5[%c0_75, %c0_76] : memref<256x256xf32, #tpu.memory_space<vmem>>, vector<256x256xf32>
    %cst_77 = arith.constant dense<0.000000e+00> : vector<8x256xf32>
    %186 = tpu.matmul %184, %185, %cst_77 {dimension_numbers = #tpu.dot_dimension_numbers<[1], [0], [0], [1], [0, 0, 1, 1], [], []>} : vector<8x256xf32>, vector<256x256xf32>, vector<8x256xf32> -> vector<8x256xf32>
    %c0_78 = arith.constant 0 : index
    %c0_79 = arith.constant 0 : index
    %187 = vector.load %arg6[%c0_78, %c0_79] : memref<1x256xf32, #tpu.memory_space<vmem>>, vector<1x256xf32>
    %188 = vector.broadcast %187 : vector<1x256xf32> to vector<8x256xf32>
    %189 = arith.addf %186, %188 : vector<8x256xf32>
    %190 = arith.addf %189, %1 : vector<8x256xf32>
    %cst_80 = arith.constant dense<0.000000e+00> : vector<8xf32>
    %191 = vector.multi_reduction <add>, %190, %cst_80 [1] : vector<8x256xf32> to vector<8xf32>
    %192 = vector.shape_cast %191 : vector<8xf32> to vector<8x1xf32>
    %cst_81 = arith.constant 2.560000e+02 : f32
    %193 = vector.broadcast %cst_81 : f32 to vector<8x1xf32>
    %194 = arith.divf %192, %193 : vector<8x1xf32>
    %195 = vector.broadcast %194 : vector<8x1xf32> to vector<8x256xf32>
    %196 = arith.subf %190, %195 : vector<8x256xf32>
    %197 = arith.mulf %196, %196 : vector<8x256xf32>
    %cst_82 = arith.constant dense<0.000000e+00> : vector<8xf32>
    %198 = vector.multi_reduction <add>, %197, %cst_82 [1] : vector<8x256xf32> to vector<8xf32>
    %199 = vector.shape_cast %198 : vector<8xf32> to vector<8x1xf32>
    %cst_83 = arith.constant 2.560000e+02 : f32
    %200 = vector.broadcast %cst_83 : f32 to vector<8x1xf32>
    %201 = arith.divf %199, %200 : vector<8x1xf32>
    %202 = vector.broadcast %194 : vector<8x1xf32> to vector<8x256xf32>
    %203 = arith.subf %190, %202 : vector<8x256xf32>
    %cst_84 = arith.constant 9.99999974E-6 : f32
    %204 = vector.broadcast %cst_84 : f32 to vector<8x1xf32>
    %205 = arith.addf %201, %204 : vector<8x1xf32>
    %206 = math.rsqrt %205 : vector<8x1xf32>
    %207 = vector.broadcast %206 : vector<8x1xf32> to vector<8x256xf32>
    %208 = arith.mulf %203, %207 : vector<8x256xf32>
    %c0_85 = arith.constant 0 : index
    %c0_86 = arith.constant 0 : index
    %209 = vector.load %arg7[%c0_85, %c0_86] : memref<1x256xf32, #tpu.memory_space<vmem>>, vector<1x256xf32>
    %210 = vector.broadcast %209 : vector<1x256xf32> to vector<8x256xf32>
    %211 = arith.mulf %208, %210 : vector<8x256xf32>
    %c0_87 = arith.constant 0 : index
    %c0_88 = arith.constant 0 : index
    %212 = vector.load %arg8[%c0_87, %c0_88] : memref<1x256xf32, #tpu.memory_space<vmem>>, vector<1x256xf32>
    %213 = vector.broadcast %212 : vector<1x256xf32> to vector<8x256xf32>
    %214 = arith.addf %211, %213 : vector<8x256xf32>
    %c0_89 = arith.constant 0 : index
    %c0_90 = arith.constant 0 : index
    %215 = vector.load %arg9[%c0_89, %c0_90] : memref<256x32xf32, #tpu.memory_space<vmem>>, vector<256x32xf32>
    %cst_91 = arith.constant dense<0.000000e+00> : vector<8x32xf32>
    %216 = tpu.matmul %214, %215, %cst_91 {dimension_numbers = #tpu.dot_dimension_numbers<[1], [0], [0], [1], [0, 0, 1, 1], [], []>} : vector<8x256xf32>, vector<256x32xf32>, vector<8x32xf32> -> vector<8x32xf32>
    %c0_92 = arith.constant 0 : index
    %c0_93 = arith.constant 0 : index
    %217 = vector.load %arg10[%c0_92, %c0_93] : memref<1x32xf32, #tpu.memory_space<vmem>>, vector<1x32xf32>
    %218 = vector.broadcast %217 : vector<1x32xf32> to vector<8x32xf32>
    %219 = arith.addf %216, %218 : vector<8x32xf32>
    %cst_94 = arith.constant 0.000000e+00 : f32
    %220 = vector.broadcast %cst_94 : f32 to vector<8x32xf32>
    %221 = arith.maximumf %219, %220 : vector<8x32xf32>
    %c0_95 = arith.constant 0 : index
    %c0_96 = arith.constant 0 : index
    %222 = vector.load %arg11[%c0_95, %c0_96] : memref<32x256xf32, #tpu.memory_space<vmem>>, vector<32x256xf32>
    %cst_97 = arith.constant dense<0.000000e+00> : vector<8x256xf32>
    %223 = tpu.matmul %221, %222, %cst_97 {dimension_numbers = #tpu.dot_dimension_numbers<[1], [0], [0], [1], [0, 0, 1, 1], [], []>} : vector<8x32xf32>, vector<32x256xf32>, vector<8x256xf32> -> vector<8x256xf32>
    %c0_98 = arith.constant 0 : index
    %c0_99 = arith.constant 0 : index
    %224 = vector.load %arg12[%c0_98, %c0_99] : memref<1x256xf32, #tpu.memory_space<vmem>>, vector<1x256xf32>
    %225 = vector.broadcast %224 : vector<1x256xf32> to vector<8x256xf32>
    %226 = arith.addf %223, %225 : vector<8x256xf32>
    %c0_100 = arith.constant 0 : index
    %c0_101 = arith.constant 0 : index
    %c0_102 = arith.constant 0 : index
    %227 = vector.load %arg13[%c0_100, %c0_101, %c0_102] : memref<1x8x256xf32, #tpu.memory_space<vmem>>, vector<1x8x256xf32>
    %228 = vector.shape_cast %227 : vector<1x8x256xf32> to vector<8x256xf32>
    %229 = vector.shape_cast %226 : vector<8x256xf32> to vector<1x8x256xf32>
    tpu.vector_store %arg13[%c0_100, %c0_101, %c0_102], %229 {strides = array<i32>} : memref<1x8x256xf32, #tpu.memory_space<vmem>>, vector<1x8x256xf32>,
    return
  }
  func.func @transform_0(%arg0: i32) -> (i32, i32, i32) {
    %c0_i32 = arith.constant 0 : i32
    %c0_i32_0 = arith.constant 0 : i32
    %c0_i32_1 = arith.constant 0 : i32
    return %arg0, %c0_i32, %c0_i32_0 : i32, i32, i32
  }
  func.func @transform_1(%arg0: i32) -> (i32, i32, i32) {
    %c0_i32 = arith.constant 0 : i32
    %c0_i32_0 = arith.constant 0 : i32
    %c0_i32_1 = arith.constant 0 : i32
    return %arg0, %c0_i32, %c0_i32_0 : i32, i32, i32
  }
  func.func @transform_2(%arg0: i32) -> (i32, i32) {
    %c0_i32 = arith.constant 0 : i32
    %c0_i32_0 = arith.constant 0 : i32
    %c0_i32_1 = arith.constant 0 : i32
    return %c0_i32, %c0_i32_0 : i32, i32
  }
  func.func @transform_3(%arg0: i32) -> (i32, i32) {
    %c0_i32 = arith.constant 0 : i32
    %c0_i32_0 = arith.constant 0 : i32
    %c0_i32_1 = arith.constant 0 : i32
    return %c0_i32, %c0_i32_0 : i32, i32
  }
  func.func @transform_4(%arg0: i32) -> (i32, i32) {
    %c0_i32 = arith.constant 0 : i32
    %c0_i32_0 = arith.constant 0 : i32
    %c0_i32_1 = arith.constant 0 : i32
    return %c0_i32, %c0_i32_0 : i32, i32
  }
  func.func @transform_5(%arg0: i32) -> (i32, i32) {
    %c0_i32 = arith.constant 0 : i32
    %c0_i32_0 = arith.constant 0 : i32
    %c0_i32_1 = arith.constant 0 : i32
    return %c0_i32, %c0_i32_0 : i32, i32
  }
  func.func @transform_6(%arg0: i32) -> (i32, i32) {
    %c0_i32 = arith.constant 0 : i32
    %c0_i32_0 = arith.constant 0 : i32
    %c0_i32_1 = arith.constant 0 : i32
    return %c0_i32, %c0_i32_0 : i32, i32
  }
  func.func @transform_7(%arg0: i32) -> (i32, i32) {
    %c0_i32 = arith.constant 0 : i32
    %c0_i32_0 = arith.constant 0 : i32
    %c0_i32_1 = arith.constant 0 : i32
    return %c0_i32, %c0_i32_0 : i32, i32
  }
  func.func @transform_8(%arg0: i32) -> (i32, i32) {
    %c0_i32 = arith.constant 0 : i32
    %c0_i32_0 = arith.constant 0 : i32
    %c0_i32_1 = arith.constant 0 : i32
    return %c0_i32, %c0_i32_0 : i32, i32
  }
  func.func @transform_9(%arg0: i32) -> (i32, i32) {
    %c0_i32 = arith.constant 0 : i32
    %c0_i32_0 = arith.constant 0 : i32
    %c0_i32_1 = arith.constant 0 : i32
    return %c0_i32, %c0_i32_0 : i32, i32
  }
  func.func @transform_10(%arg0: i32) -> (i32, i32) {
    %c0_i32 = arith.constant 0 : i32
    %c0_i32_0 = arith.constant 0 : i32
    %c0_i32_1 = arith.constant 0 : i32
    return %c0_i32, %c0_i32_0 : i32, i32
  }
  func.func @transform_11(%arg0: i32) -> (i32, i32) {
    %c0_i32 = arith.constant 0 : i32
    %c0_i32_0 = arith.constant 0 : i32
    %c0_i32_1 = arith.constant 0 : i32
    return %c0_i32, %c0_i32_0 : i32, i32
  }
  func.func @transform_12(%arg0: i32) -> (i32, i32, i32) {
    %c0_i32 = arith.constant 0 : i32
    %c0_i32_0 = arith.constant 0 : i32
    %c0_i32_1 = arith.constant 0 : i32
    return %arg0, %c0_i32, %c0_i32_0 : i32, i32, i32
  }
  func.func @transform_13(%arg0: i32) -> (i32, i32, i32, i32) {
    %c0_i32 = arith.constant 0 : i32
    %c0_i32_0 = arith.constant 0 : i32
    %c0_i32_1 = arith.constant 0 : i32
    %c0_i32_2 = arith.constant 0 : i32
    return %arg0, %c0_i32, %c0_i32_0, %c0_i32_1 : i32, i32, i32, i32
  }
}

</mosaic_0001>

<bundles_post_ra>
// kernel: encoder_layer.1
= control target key start
LH: loop header
LB: loop body
LE: loop exit
PB: predicated region body
PF: predicated region fallthrough
CT: control target
= control target key end

     0   :  { %s2909_s0 = inlined_call_operand.vmem [shape: f32[2,8,256], index: 0, kind: input, shape index: {}]   ;;  %s2910_s1 = inlined_call_operand.vmem [shape: s32[2,8,8], index: 1, kind: input, shape index: {}]   ;;  %s2911_s2 = inlined_call_operand.hbm [shape: f32[256,768], index: 2, kind: input, shape index: {}]   ;;  %s2912_s3 = inlined_call_operand.vmem [shape: f32[1,768], index: 3, kind: input, shape index: {}]   ;;  %s2913_s4 = inlined_call_operand.hbm [shape: f32[256,256], index: 4, kind: input, shape index: {}]   ;;  %s2914_s5 = inlined_call_operand.vmem [shape: f32[1,256], index: 5, kind: input, shape index: {}]   ;;  %s2915_s6 = inlined_call_operand.vmem [shape: f32[1,256], index: 6, kind: input, shape index: {}]   ;;  %s2916_s7 = inlined_call_operand.vmem [shape: f32[1,256], index: 7, kind: input, shape index: {}]   ;;  %s2917_s8 = inlined_call_operand.vmem [shape: f32[256,32], index: 8, kind: input, shape index: {}]   ;;  %s2918_s9 = inlined_call_operand.vmem [shape: f32[1,32], index: 9, kind: input, shape index: {}]   ;;  %s2919_s10 = inlined_call_operand.vmem [shape: f32[32,256], index: 10, kind: input, shape index: {}]   ;;  %s2920_s11 = inlined_call_operand.vmem [shape: f32[1,256], index: 11, kind: input, shape index: {}]   ;;  %s2921_s12 = inlined_call_operand.hbm [shape: f32[2,8,256], index: 12, kind: output, shape index: {0}]   ;;  %s2922_s13 = inlined_call_operand.hbm [shape: f32[2,8,8,8], index: 13, kind: output, shape index: {1}]  }
   0x1   :  { %2927 = sst [smem:[#allocation18_spill]] %s2909_s0 }
   0x2   :  { %2928 = sst [smem:[#allocation19_spill]] %s2910_s1 }
   0x3   :  { %2929 = sst [smem:[#allocation20_spill]] %s2911_s2 }
   0x4   :  { %2930 = sst [smem:[#allocation21_spill]] %s2912_s3 }
   0x5   :  { %19 = vsyncpa [#allocation3], 0 }
   0x6   :  { %20 = vsyncpa [#allocation6], 0 }
   0x7   :  { %21 = vsyncpa [#allocation4], 0 }
   0x8   :  { %23 = vsyncpa [#allocation4 + $0x1], 0 }
   0x9   :  { %24 = vsyncpa [#allocation9], 0 }
   0xa   :  { %26 = vsyncpa [#allocation9 + $0x1], 0  ;;  %s2460_s25 = smov 0   ;;  %s2462_s26 = smov 0  }
   0xb   :  { %s2464_s27 = smov 0   ;;  %s2466_s28 = smov 0  }
   0xc LB: > { %2931 = sst [smem:[#allocation14_spill]] %s2372_s27  ;;  %s2481_s29 = sadd.s32 4294967295, %s2376_s28   ;;  %s2376_s28 = sphi %s2466_s28, %s2943_s28   ;;  %s2372_s27 = sphi %s2464_s27, %s2945_s27   ;;  %s2368_s26 = sphi %s2462_s26, %s2947_s26   ;;  %s2364_s25 = sphi %s2460_s25, %s2946_s25  }
   0xd   : > { %s2023_s30 = sadd.s32 4294967294, %s2376_s28   ;;  %s2485_s14 = sadd.s32 1, %s2376_s28  }
   0xe   : > { %2932 = sst [smem:[#allocation15_spill]] %s2485_s14  ;;  %s301_s15 = sadd.s32 1, %s2372_s27 }
   0xf   : > { %s298_s16 = ssub.s32 %s2376_s28, %s2485_s14  ;;  %p311_p0 = scmp.ne.s32.totalorder %s2372_s27, %s2368_s26 }
  0x10   : > { %p299_p1 = scmp.eq.s32.totalorder %s298_s16, 0  ;;  %p312_p2 = scmp.eq.s32.totalorder %s2481_s29, 1 }
  0x11   : > { %p317_p3 = scmp.ne.s32.totalorder %s2368_s26, %s2364_s25  ;;  %p318_p4 = scmp.eq.s32.totalorder %s2023_s30, 1 }
  0x12   : > { %s2496_s17 = scalar_select %p299_p1, %s2372_s27, %s301_s15  }
  0x13   : > { %p2498_p5 = por %p312_p2, %p311_p0  ;;  %p2502_p6 = por %p318_p4, %p317_p3 }
  0x14   : > { %2933 = sst [smem:[#allocation16_spill]] %s2496_s17  ;;  %p2024_p7 = scmp.ge.s32.totalorder %s2376_s28, 1 }
  0x15   : > { %s2935_s19 = scalar_select %p2502_p6, 1, 0 }
  0x16   : > { %p351_p8 = scmp.lt.s32.totalorder %s2376_s28, 3  ;;  %p2106_p9 = scmp.eq.s32.totalorder %s2481_s29, 0 }
  0x17   : > { %2936 = sst [smem:[#allocation17_spill]] %s2935_s19  ;;  %s2378_s24 = smov [#allocation2]  }
  0x18   : > { %p2509_p10 = pnand %p2024_p7, %p351_p8  ;;  %s2938_s2 = sld [smem:[#allocation20_spill]] }
  0x19   : > { %s364_s30 = sshll.u32 %s2378_s24, 4  ;;  %s379_s17 = sshll.u32 %s2913_s4, 4  ;;  %s365_s30 = int_to_ptr.vmem [resolvable:$true] %s364_s30  ;;  %s380_s17 = int_to_ptr.hbm [resolvable:$true] %s379_s17 }
  0x1a   : > { %p2092_p11 = pneg %p2509_p10  ;;  %s2379_s27 = smov 768  }
  0x1b   : > { %s2380_s14 = smov 48   ;;  %s2381_s19 = smov [#allocation5]  }
  0x1c   : > { %p2093_p12 = pnand %p2106_p9, %p2092_p11  ;;  %s381_s21 = sshll.u32 %s2381_s19, 4  ;;  %s382_s21 = int_to_ptr.vmem [resolvable:$true] %s381_s21 }
  0x1d   : > { %s2382_s22 = smov 256   ;;  %433 = sbr.rel (%p2509_p10) target bundleno = 1742 (0x6ce), region = 68 }
  0x1e   : > { %s362_s23 = sshll.u32 %s2938_s2, 4  ;;  %s2383_s2 = smov 16   ;;  %s363_s23 = int_to_ptr.hbm [resolvable:$true] %s362_s23 }
  0x1f   : > { %2095 = dma.hbm_to_vmem [thread:$0]  (!%p2093_p12), %s363_s23, 24576, %s365_s30, [#allocation3], %s2379_s27, %s2379_s27, %s2380_s14  }
  0x20   : > { %2098 = dma.hbm_to_vmem [thread:$0]  (!%p2093_p12), %s380_s17, 8192, %s382_s21, [#allocation6], %s2382_s22, %s2382_s22, %s2383_s2  }
  0x22   : > { %2347 = dma.done.wait (%p2106_p9), [#allocation3], 24576  }
  0x23   : > { %2349 = vsyncadd (%p2106_p9), [#allocation3], 4294942720 }
  0x24   : > { %2351 = dma.done.wait (%p2106_p9), [#allocation6], 8192  }
  0x25   : > { %2353 = vsyncadd (%p2106_p9), [#allocation6], 4294959104  ;;  %v595_v0 = vld [vmem:[#allocation2 + $0x2d0] sm:$0xff]  ;;  %v589_v1 = vld [vmem:[#allocation2 + $0x2a0] sm:$0xff]  ;;  %p492_p13 = scmp.lt.s32.totalorder %s2481_s29, 1  ;;  %s2939_s0 = sld [smem:[#allocation18_spill]] }
  0x26   : > { %v691_v2 = vld [vmem:[#allocation2 + $0x5d0] sm:$0xff]  ;;  %711 = vmatpush.msra.mxu0 %v595_v0  ;;  %v685_v3 = vld [vmem:[#allocation2 + $0x5a0] sm:$0xff]  ;;  %v596_v10 = vld [vmem:[#allocation2 + $0x2d8] sm:$0xff]  ;;  %s2940_s3 = sld [smem:[#allocation21_spill]]  ;;  %vm953_vm0 = vcmask 261120   ;;  %s2384_s24 = smov 64  }
  0x27   : > { %731 = vmatpush.msra.mxu1 %v691_v2  ;;  %v583_v4 = vld [vmem:[#allocation2 + $0x270] sm:$0xff]  ;;  %v577_v6 = vld [vmem:[#allocation2 + $0x240] sm:$0xff]  ;;  %751 = vmatpush.msra.mxu2 %v596_v10  ;;  %v590_v13 = vld [vmem:[#allocation2 + $0x2a8] sm:$0xff]  ;;  %s2537_s2 = scalar_select %p492_p13, %s2481_s29, 1  ;;  %vm981_vm2 = vcmask 64512   ;;  %vm1515_vm3 = vcmask 523264  }
  0x28   : > { %v679_v5 = vld [vmem:[#allocation2 + $0x570] sm:$0xff]  ;;  %712 = vmatpush.msra.mxu0 %v589_v1  ;;  %v673_v7 = vld [vmem:[#allocation2 + $0x540] sm:$0xff]  ;;  %v692_v15 = vld [vmem:[#allocation2 + $0x5d8] sm:$0xff]  ;;  %s2385_s30 = smov 32   ;;  %s2386_s15 = smov 96   ;;  %vm1517_vm4 = vcmask 785408  }
  0x29   : > { %732 = vmatpush.msra.mxu1 %v685_v3  ;;  %v571_v8 = vld [vmem:[#allocation2 + $0x210] sm:$0xff]  ;;  %v565_v11 = vld [vmem:[#allocation2 + $0x1e0] sm:$0xff]  ;;  %752 = vmatpush.msra.mxu2 %v590_v13  ;;  %v584_v17 = vld [vmem:[#allocation2 + $0x278] sm:$0xff]  ;;  %s2077_s27 = sshll.u32 %s2537_s2, 4  ;;  %s2035_s16 = sshll.u32 %s2537_s2, 3 }
  0x2a   : > { %713 = vmatpush.msra.mxu0 %v583_v4  ;;  %v667_v9 = vld [vmem:[#allocation2 + $0x510] sm:$0xff]  ;;  %v661_v12 = vld [vmem:[#allocation2 + $0x4e0] sm:$0xff]  ;;  %771 = vmatpush.msra.mxu3 %v692_v15  ;;  %v686_v18 = vld [vmem:[#allocation2 + $0x5a8] sm:$0xff]  ;;  %s2941_s1 = sld [smem:[#allocation19_spill]]  ;;  %s2653_s2 = sand.u32 1, %s2368_s26  }
  0x2b   : > { %733 = vmatpush.msra.mxu1 %v679_v5  ;;  %v559_v14 = vld [vmem:[#allocation2 + $0x1b0] sm:$0xff]  ;;  %v578_v19 = vld [vmem:[#allocation2 + $0x248] sm:$0xff]  ;;  %v680_v20 = vld [vmem:[#allocation2 + $0x578] sm:$0xff]  ;;  %753 = vmatpush.msra.mxu2 %v584_v17  ;;  %s2543_s19 = scalar_lea.vmem %s2939_s0, %s2077_s27  ;;  %s2032_s14 = sshll.u32 %s2653_s2, 6 }
  0x2c   : > { %714 = vmatpush.msra.mxu0 %v577_v6  ;;  %v655_v16 = vld [vmem:[#allocation2 + $0x4b0] sm:$0xff]  ;;  %v553_v21 = vld [vmem:[#allocation2 + $0x180] sm:$0xff]  ;;  %772 = vmatpush.msra.mxu3 %v686_v18  ;;  %v572_v23 = vld [vmem:[#allocation2 + $0x218] sm:$0xff]  ;;  %s2659_s17 = scalar_lea.vmem [#allocation8], %s2032_s14  ;;  %s2079_s23 = sshll.u32 %s2481_s29, 6 }
  0x2d   : > { %734 = vmatpush.msra.mxu1 %v673_v7  ;;  %v649_v22 = vld [vmem:[#allocation2 + $0x480] sm:$0xff]  ;;  %v674_v24 = vld [vmem:[#allocation2 + $0x548] sm:$0xff]  ;;  %v547_v25 = vld [vmem:[#allocation2 + $0x150] sm:$0xff]  ;;  %754 = vmatpush.msra.mxu2 %v578_v19  ;;  %s1891_s20 = sshll.u32 %s2659_s17, 4  ;;  %s1864_s21 = scalar_lea.sflag [#allocation9], %s2653_s2  ;;  %s1892_s20 = int_to_ptr.vmem [resolvable:$true] %s1891_s20 }
  0x2e   : > { %715 = vmatpush.msra.mxu0 %v571_v8  ;;  %v643_v26 = vld [vmem:[#allocation2 + $0x450] sm:$0xff]  ;;  %773 = vmatpush.msra.mxu3 %v680_v20  ;;  %v566_v27 = vld [vmem:[#allocation2 + $0x1e8] sm:$0xff]  ;;  %v668_v28 = vld [vmem:[#allocation2 + $0x518] sm:$0xff] }
  0x2f   : > { %735 = vmatpush.msra.mxu1 %v667_v9  ;;  %v541_v29 = vld [vmem:[#allocation2 + $0x120] sm:$0xff]  ;;  %755 = vmatpush.msra.mxu2 %v572_v23  ;;  %v560_v31 = vld [vmem:[#allocation2 + $0x1b8] sm:$0xff]  ;;  %v662_v32 = vld [vmem:[#allocation2 + $0x4e8] sm:$0xff] }
  0x30   : > { %716 = vmatpush.msra.mxu0 %v565_v11  ;;  %v637_v30 = vld [vmem:[#allocation2 + $0x420] sm:$0xff]  ;;  %774 = vmatpush.msra.mxu3 %v674_v24  ;;  %v535_v33 = vld [vmem:[#allocation2 + $0xf0] sm:$0xff]  ;;  %v554_v35 = vld [vmem:[#allocation2 + $0x188] sm:$0xff]  ;;  %s500_s27 = scalar_lea.vmem %s2941_s1, %s2035_s16 }
  0x31   : > { %736 = vmatpush.msra.mxu1 %v661_v12  ;;  %v631_v34 = vld [vmem:[#allocation2 + $0x3f0] sm:$0xff]  ;;  %756 = vmatpush.msra.mxu2 %v566_v27  ;;  %v656_v36 = vld [vmem:[#allocation2 + $0x4b8] sm:$0xff]  ;;  %v529_v37 = vld [vmem:[#allocation2 + $0xc0] sm:$0xff] }
  0x32   : > { %717 = vmatpush.msra.mxu0 %v559_v14  ;;  %775 = vmatpush.msra.mxu3 %v668_v28  ;;  %v625_v38 = vld [vmem:[#allocation2 + $0x3c0] sm:$0xff]  ;;  %v548_v39 = vld [vmem:[#allocation2 + $0x158] sm:$0xff]  ;;  %v650_v40 = vld [vmem:[#allocation2 + $0x488] sm:$0xff] }
  0x33   : > { %737 = vmatpush.msra.mxu1 %v655_v16  ;;  %757 = vmatpush.msra.mxu2 %v560_v31  ;;  %v523_v41 = vld [vmem:[#allocation2 + $0x90] sm:$0xff]  ;;  %v542_v43 = vld [vmem:[#allocation2 + $0x128] sm:$0xff]  ;;  %v644_v44 = vld [vmem:[#allocation2 + $0x458] sm:$0xff] }
  0x34   : > { %718 = vmatpush.msra.mxu0 %v553_v21  ;;  %776 = vmatpush.msra.mxu3 %v662_v32  ;;  %v619_v42 = vld [vmem:[#allocation2 + $0x390] sm:$0xff]  ;;  %v517_v45 = vld [vmem:[#allocation2 + $0x60] sm:$0xff]  ;;  %v536_v47 = vld [vmem:[#allocation2 + $0xf8] sm:$0xff] }
  0x35   : > { %738 = vmatpush.msra.mxu1 %v649_v22  ;;  %758 = vmatpush.msra.mxu2 %v554_v35  ;;  %v613_v46 = vld [vmem:[#allocation2 + $0x360] sm:$0xff]  ;;  %v638_v48 = vld [vmem:[#allocation2 + $0x428] sm:$0xff]  ;;  %v511_v49 = vld [vmem:[#allocation2 + $0x30] sm:$0xff] }
  0x36   : > { %719 = vmatpush.msra.mxu0 %v547_v25  ;;  %777 = vmatpush.msra.mxu3 %v656_v36  ;;  %v607_v50 = vld [vmem:[#allocation2 + $0x330] sm:$0xff]  ;;  %v530_v51 = vld [vmem:[#allocation2 + $0xc8] sm:$0xff]  ;;  %v632_v52 = vld [vmem:[#allocation2 + $0x3f8] sm:$0xff] }
  0x37   : > { %739 = vmatpush.msra.mxu1 %v643_v26  ;;  %759 = vmatpush.msra.mxu2 %v548_v39  ;;  %v505_v53 = vld [vmem:[#allocation2] sm:$0xff]  ;;  %v524_v57 = vld [vmem:[#allocation2 + $0x98] sm:$0xff]  ;;  %v626_v58 = vld [vmem:[#allocation2 + $0x3c8] sm:$0xff] }
  0x38   : > { %720 = vmatpush.msra.mxu0 %v541_v29  ;;  %778 = vmatpush.msra.mxu3 %v650_v40  ;;  %v601_v54 = vld [vmem:[#allocation2 + $0x300] sm:$0xff]  ;;  %v591_v59 = vld [vmem:[#allocation2 + $0x2b0] sm:$0xff]  ;;  %v518_v61 = vld [vmem:[#allocation2 + $0x68] sm:$0xff] }
  0x39   : > { %740 = vmatpush.msra.mxu1 %v637_v30  ;;  %760 = vmatpush.msra.mxu2 %v542_v43  ;;  %v597_v55 = vld [vmem:[#allocation2 + $0x2e0] sm:$0xff]  ;;  %v687_v60 = vld [vmem:[#allocation2 + $0x5b0] sm:$0xff]  ;;  %v620_v62 = vld [vmem:[#allocation2 + $0x398] sm:$0xff] }
  0x3a   : > { %721 = vmatpush.msra.mxu0 %v535_v33  ;;  %779 = vmatpush.msra.mxu3 %v644_v44  ;;  %v693_v56 = vld [vmem:[#allocation2 + $0x5e0] sm:$0xff]  ;;  %v512_v1 = vld [vmem:[#allocation2 + $0x38] sm:$0xff]  ;;  %v614_v2 = vld [vmem:[#allocation2 + $0x368] sm:$0xff] }
  0x3b   : > { %741 = vmatpush.msra.mxu1 %v631_v34  ;;  %761 = vmatpush.msra.mxu2 %v536_v47  ;;  %v585_v63 = vld [vmem:[#allocation2 + $0x280] sm:$0xff]  ;;  %v579_v3 = vld [vmem:[#allocation2 + $0x250] sm:$0xff]  ;;  %v506_v5 = vld [vmem:[#allocation2 + $0x8] sm:$0xff] }
  0x3c   : > { %722 = vmatpush.msra.mxu0 %v529_v37  ;;  %780 = vmatpush.msra.mxu3 %v638_v48  ;;  %v681_v0 = vld [vmem:[#allocation2 + $0x580] sm:$0xff]  ;;  %v675_v4 = vld [vmem:[#allocation2 + $0x550] sm:$0xff]  ;;  %v608_v6 = vld [vmem:[#allocation2 + $0x338] sm:$0xff] }
  0x3d   : > { %742 = vmatpush.msra.mxu1 %v625_v38  ;;  %762 = vmatpush.msra.mxu2 %v530_v51  ;;  %v573_v7 = vld [vmem:[#allocation2 + $0x220] sm:$0xff]  ;;  %v598_v10 = vld [vmem:[#allocation2 + $0x2e8] sm:$0xff]  ;;  %v567_v11 = vld [vmem:[#allocation2 + $0x1f0] sm:$0xff] }
  0x3e   : > { %723 = vmatpush.msra.mxu0 %v523_v41  ;;  %781 = vmatpush.msra.mxu3 %v632_v52  ;;  %v669_v8 = vld [vmem:[#allocation2 + $0x520] sm:$0xff]  ;;  %v663_v12 = vld [vmem:[#allocation2 + $0x4f0] sm:$0xff]  ;;  %v602_v13 = vld [vmem:[#allocation2 + $0x308] sm:$0xff] }
  0x3f   : > { %743 = vmatpush.msra.mxu1 %v619_v42  ;;  %763 = vmatpush.msra.mxu2 %v524_v57  ;;  %v2546_v9 = vld [vmem:[%s2543_s19] sm:$0xff]  ;;  %v2549_v14 = vld [vmem:[%s2543_s19 + $0x8] sm:$0xff]  ;;  %v592_v17 = vld [vmem:[#allocation2 + $0x2b8] sm:$0xff] }
  0x40   : > { %724 = vmatpush.msra.mxu0 %v517_v45  ;;  %782 = vmatpush.msra.mxu3 %v626_v58  ;;  %v561_v15 = vld [vmem:[#allocation2 + $0x1c0] sm:$0xff]  ;;  %v694_v18 = vld [vmem:[#allocation2 + $0x5e8] sm:$0xff]  ;;  %v555_v19 = vld [vmem:[#allocation2 + $0x190] sm:$0xff] }
  0x41   : > { %744 = vmatpush.msra.mxu1 %v613_v46  ;;  %764 = vmatpush.msra.mxu2 %v518_v61  ;;  %v657_v16 = vld [vmem:[#allocation2 + $0x4c0] sm:$0xff]  ;;  %v651_v20 = vld [vmem:[#allocation2 + $0x490] sm:$0xff]  ;;  %v586_v21 = vld [vmem:[#allocation2 + $0x288] sm:$0xff] }
  0x42   : > { %725 = vmatpush.msra.mxu0 %v511_v49  ;;  %783 = vmatpush.msra.mxu3 %v620_v62  ;;  %v688_v22 = vld [vmem:[#allocation2 + $0x5b8] sm:$0xff]  ;;  %v549_v23 = vld [vmem:[#allocation2 + $0x160] sm:$0xff]  ;;  %v682_v26 = vld [vmem:[#allocation2 + $0x588] sm:$0xff] }
  0x43   : > { %745 = vmatpush.msra.mxu1 %v607_v50  ;;  %765 = vmatpush.msra.mxu2 %v512_v1  ;;  %v645_v24 = vld [vmem:[#allocation2 + $0x460] sm:$0xff]  ;;  %v580_v25 = vld [vmem:[#allocation2 + $0x258] sm:$0xff]  ;;  %v543_v27 = vld [vmem:[#allocation2 + $0x130] sm:$0xff] }
  0x44   : > { %726 = vmatpush.msra.mxu0 %v505_v53  ;;  %784 = vmatpush.msra.mxu3 %v614_v2  ;;  %v639_v28 = vld [vmem:[#allocation2 + $0x430] sm:$0xff]  ;;  %v574_v29 = vld [vmem:[#allocation2 + $0x228] sm:$0xff]  ;;  %v676_v30 = vld [vmem:[#allocation2 + $0x558] sm:$0xff] }
  0x45   : > { %746 = vmatpush.msra.mxu1 %v601_v54  ;;  %766 = vmatpush.msra.mxu2 %v506_v5  ;;  %v537_v31 = vld [vmem:[#allocation2 + $0x100] sm:$0xff]  ;;  %v568_v33 = vld [vmem:[#allocation2 + $0x1f8] sm:$0xff]  ;;  %v670_v34 = vld [vmem:[#allocation2 + $0x528] sm:$0xff] }
  0x46   : > { %791 = vmatpush.msrb.mxu0 %v597_v55  ;;  %785 = vmatpush.msra.mxu3 %v608_v6  ;;  %v633_v32 = vld [vmem:[#allocation2 + $0x400] sm:$0xff]  ;;  %v531_v35 = vld [vmem:[#allocation2 + $0xd0] sm:$0xff]  ;;  %v562_v37 = vld [vmem:[#allocation2 + $0x1c8] sm:$0xff] }
  0x47   : > { %811 = vmatpush.msrb.mxu1 %v693_v56  ;;  %727 = vmatmul.f32.vlgmr.msra.gmra.mxu0 %v2546_v9  ;;  %v627_v36 = vld [vmem:[#allocation2 + $0x3d0] sm:$0xff]  ;;  %v664_v38 = vld [vmem:[#allocation2 + $0x4f8] sm:$0xff]  ;;  %v525_v39 = vld [vmem:[#allocation2 + $0xa0] sm:$0xff] }
  0x48   : > { %792 = vmatpush.msrb.mxu0 %v591_v59  ;;  %831 = vmatpush.msrb.mxu2 %v598_v10  ;;  %v621_v40 = vld [vmem:[#allocation2 + $0x3a0] sm:$0xff]  ;;  %v556_v41 = vld [vmem:[#allocation2 + $0x198] sm:$0xff]  ;;  %v658_v42 = vld [vmem:[#allocation2 + $0x4c8] sm:$0xff] }
  0x49   : > { %812 = vmatpush.msrb.mxu1 %v687_v60  ;;  %786 = vmatpush.msra.mxu3 %v602_v13  ;;  %v519_v43 = vld [vmem:[#allocation2 + $0x70] sm:$0xff]  ;;  %v550_v45 = vld [vmem:[#allocation2 + $0x168] sm:$0xff]  ;;  %v652_v46 = vld [vmem:[#allocation2 + $0x498] sm:$0xff] }
  0x4a   : > { %793 = vmatpush.msrb.mxu0 %v585_v63  ;;  %747 = vmatmul.f32.vlgmr.msra.gmra.mxu1 %v2549_v14  ;;  %v615_v44 = vld [vmem:[#allocation2 + $0x370] sm:$0xff]  ;;  %v513_v47 = vld [vmem:[#allocation2 + $0x40] sm:$0xff]  ;;  %v544_v49 = vld [vmem:[#allocation2 + $0x138] sm:$0xff] }
  0x4b   : > { %813 = vmatpush.msrb.mxu1 %v681_v0  ;;  %832 = vmatpush.msrb.mxu2 %v592_v17  ;;  %v609_v48 = vld [vmem:[#allocation2 + $0x340] sm:$0xff]  ;;  %v646_v50 = vld [vmem:[#allocation2 + $0x468] sm:$0xff]  ;;  %v507_v51 = vld [vmem:[#allocation2 + $0x10] sm:$0xff] }
  0x4c   : > { %794 = vmatpush.msrb.mxu0 %v579_v3  ;;  %851 = vmatpush.msrb.mxu3 %v694_v18  ;;  %v603_v52 = vld [vmem:[#allocation2 + $0x310] sm:$0xff]  ;;  %v538_v53 = vld [vmem:[#allocation2 + $0x108] sm:$0xff]  ;;  %v640_v54 = vld [vmem:[#allocation2 + $0x438] sm:$0xff] }
  0x4d   : > { %814 = vmatpush.msrb.mxu1 %v675_v4  ;;  %833 = vmatpush.msrb.mxu2 %v586_v21  ;;  %v532_v55 = vld [vmem:[#allocation2 + $0xd8] sm:$0xff]  ;;  %v634_v56 = vld [vmem:[#allocation2 + $0x408] sm:$0xff] }
  0x4e   : > { %795 = vmatpush.msrb.mxu0 %v573_v7  ;;  %852 = vmatpush.msrb.mxu3 %v688_v22  ;;  %v526_v57 = vld [vmem:[#allocation2 + $0xa8] sm:$0xff]  ;;  %v628_v58 = vld [vmem:[#allocation2 + $0x3d8] sm:$0xff]  ;;  %v2563_v22 = vld [vmem:[%s2940_s3] sm:$0x3f] }
  0x4f   : > { %815 = vmatpush.msrb.mxu1 %v669_v8  ;;  %834 = vmatpush.msrb.mxu2 %v580_v25  ;;  %v520_v59 = vld [vmem:[#allocation2 + $0x78] sm:$0xff]  ;;  %v622_v60 = vld [vmem:[#allocation2 + $0x3a8] sm:$0xff] }
  0x50   : > { %796 = vmatpush.msrb.mxu0 %v567_v11  ;;  %853 = vmatpush.msrb.mxu3 %v682_v26  ;;  %v514_v61 = vld [vmem:[#allocation2 + $0x48] sm:$0xff]  ;;  %v616_v62 = vld [vmem:[#allocation2 + $0x378] sm:$0xff] }
  0x51   : > { %816 = vmatpush.msrb.mxu1 %v663_v12  ;;  %835 = vmatpush.msrb.mxu2 %v574_v29  ;;  %v508_v63 = vld [vmem:[#allocation2 + $0x18] sm:$0xff]  ;;  %v610_v0 = vld [vmem:[#allocation2 + $0x348] sm:$0xff] }
  0x52   : > { %797 = vmatpush.msrb.mxu0 %v561_v15  ;;  %854 = vmatpush.msrb.mxu3 %v676_v30  ;;  %v604_v1 = vld [vmem:[#allocation2 + $0x318] sm:$0xff]  ;;  %v594_v3 = vld [vmem:[#allocation2 + $0x2c8] sm:$0xff] }
  0x53   : > { %817 = vmatpush.msrb.mxu1 %v657_v16  ;;  %836 = vmatpush.msrb.mxu2 %v568_v33  ;;  %v600_v2 = vld [vmem:[#allocation2 + $0x2f8] sm:$0xff]  ;;  %v582_v5 = vld [vmem:[#allocation2 + $0x268] sm:$0xff]  ;;  %v599_v33 = vld [vmem:[#allocation2 + $0x2f0] sm:$0xff] }
  0x54   : > { %798 = vmatpush.msrb.mxu0 %v555_v19  ;;  %855 = vmatpush.msrb.mxu3 %v670_v34  ;;  %v588_v4 = vld [vmem:[#allocation2 + $0x298] sm:$0xff]  ;;  %v570_v7 = vld [vmem:[#allocation2 + $0x208] sm:$0xff]  ;;  %v593_v34 = vld [vmem:[#allocation2 + $0x2c0] sm:$0xff] }
  0x55   : > { %818 = vmatpush.msrb.mxu1 %v651_v20  ;;  %837 = vmatpush.msrb.mxu2 %v562_v37  ;;  %v576_v6 = vld [vmem:[#allocation2 + $0x238] sm:$0xff]  ;;  %v558_v10 = vld [vmem:[#allocation2 + $0x1a8] sm:$0xff] }
  0x56   : > { %799 = vmatpush.msrb.mxu0 %v549_v23  ;;  %856 = vmatpush.msrb.mxu3 %v664_v38  ;;  %v564_v8 = vld [vmem:[#allocation2 + $0x1d8] sm:$0xff]  ;;  %v546_v12 = vld [vmem:[#allocation2 + $0x148] sm:$0xff]  ;;  %v699_v23 = vperm.slane %v2563_v22, 0 }
  0x57   : > { %819 = vmatpush.msrb.mxu1 %v645_v24  ;;  %838 = vmatpush.msrb.mxu2 %v556_v41  ;;  %v552_v11 = vld [vmem:[#allocation2 + $0x178] sm:$0xff]  ;;  %v534_v15 = vld [vmem:[#allocation2 + $0xe8] sm:$0xff]  ;;  %v701_v24 = vperm.slane %v2563_v22, 2 }
  0x58   : > { %800 = vmatpush.msrb.mxu0 %v543_v27  ;;  %857 = vmatpush.msrb.mxu3 %v658_v42  ;;  %v540_v13 = vld [vmem:[#allocation2 + $0x118] sm:$0xff]  ;;  %v522_v17 = vld [vmem:[#allocation2 + $0x88] sm:$0xff]  ;;  %v575_v42 = vld [vmem:[#allocation2 + $0x230] sm:$0xff] }
  0x59   : > { %820 = vmatpush.msrb.mxu1 %v639_v28  ;;  %839 = vmatpush.msrb.mxu2 %v550_v45  ;;  %v528_v16 = vld [vmem:[#allocation2 + $0xb8] sm:$0xff]  ;;  %v510_v19 = vld [vmem:[#allocation2 + $0x28] sm:$0xff]  ;;  %v569_v45 = vld [vmem:[#allocation2 + $0x200] sm:$0xff] }
  0x5a   : > { %801 = vmatpush.msrb.mxu0 %v537_v31  ;;  %858 = vmatpush.msrb.mxu3 %v652_v46  ;;  %v516_v18 = vld [vmem:[#allocation2 + $0x58] sm:$0xff]  ;;  %v700_v31 = vperm.slane %v2563_v22, 1  ;;  %v690_v41 = vld [vmem:[#allocation2 + $0x5c8] sm:$0xff]  ;;  %v563_v46 = vld [vmem:[#allocation2 + $0x1d0] sm:$0xff] }
  0x5b   : > { %821 = vmatpush.msrb.mxu1 %v633_v32  ;;  %840 = vmatpush.msrb.mxu2 %v544_v49 }
  0x5c   : > { %802 = vmatpush.msrb.mxu0 %v531_v35  ;;  %859 = vmatpush.msrb.mxu3 %v646_v50  ;;  %v557_v50 = vld [vmem:[#allocation2 + $0x1a0] sm:$0xff] }
  0x5d   : > { %822 = vmatpush.msrb.mxu1 %v627_v36  ;;  %841 = vmatpush.msrb.mxu2 %v538_v53  ;;  %v587_v36 = vld [vmem:[#allocation2 + $0x290] sm:$0xff] }
  0x5e   : > { %803 = vmatpush.msrb.mxu0 %v525_v39  ;;  %860 = vmatpush.msrb.mxu3 %v640_v54  ;;  %v581_v39 = vld [vmem:[#allocation2 + $0x260] sm:$0xff]  ;;  %v551_v53 = vld [vmem:[#allocation2 + $0x170] sm:$0xff] }
  0x5f   : > { %823 = vmatpush.msrb.mxu1 %v621_v40  ;;  %767 = vmatmul.f32.vlgmr.msra.gmra.mxu2 %v2546_v9  ;;  %v696_v40 = vld [vmem:[#allocation2 + $0x5f8] sm:$0xff]  ;;  %v545_v54 = vld [vmem:[#allocation2 + $0x140] sm:$0xff] }
  0x60   : > { %804 = vmatpush.msrb.mxu0 %v519_v43  ;;  %787 = vmatmul.f32.vlgmr.msra.gmra.mxu3 %v2549_v14 }
  0x61   : > { %824 = vmatpush.msrb.mxu1 %v615_v44  ;;  %842 = vmatpush.msrb.mxu2 %v532_v55  ;;  %v702_v44 = vperm.slane %v2563_v22, 3  ;;  %v539_v55 = vld [vmem:[#allocation2 + $0x110] sm:$0xff] }
  0x62   : > { %805 = vmatpush.msrb.mxu0 %v513_v47  ;;  %861 = vmatpush.msrb.mxu3 %v634_v56  ;;  %v533_v56 = vld [vmem:[#allocation2 + $0xe0] sm:$0xff] }
  0x63   : > { %825 = vmatpush.msrb.mxu1 %v609_v48  ;;  %843 = vmatpush.msrb.mxu2 %v526_v57  ;;  %v527_v57 = vld [vmem:[#allocation2 + $0xb0] sm:$0xff] }
  0x64   : > { %806 = vmatpush.msrb.mxu0 %v507_v51  ;;  %862 = vmatpush.msrb.mxu3 %v628_v58  ;;  %v521_v58 = vld [vmem:[#allocation2 + $0x80] sm:$0xff] }
  0x65   : > { %826 = vmatpush.msrb.mxu1 %v603_v52  ;;  %807 = vmatmul.f32.vlgmr.msrb.gmra.mxu0 %v2546_v9 }
  0x66   : > { %827 = vmatmul.f32.vlgmr.msrb.gmra.mxu1 %v2549_v14  ;;  %844 = vmatpush.msrb.mxu2 %v520_v59  ;;  %v515_v59 = vld [vmem:[#allocation2 + $0x50] sm:$0xff] }
  0x67   : > { %863 = vmatpush.msrb.mxu3 %v622_v60  ;;  %871 = vmatpush.msra.mxu0 %v599_v33  ;;  %v509_v60 = vld [vmem:[#allocation2 + $0x20] sm:$0xff] }
  0x68   : > { %845 = vmatpush.msrb.mxu2 %v514_v61  ;;  %v684_v61 = vld [vmem:[#allocation2 + $0x598] sm:$0xff] }
  0x69   : > { %864 = vmatpush.msrb.mxu3 %v616_v62  ;;  %872 = vmatpush.msra.mxu0 %v593_v34  ;;  %v695_v62 = vld [vmem:[#allocation2 + $0x5f0] sm:$0xff] }
  0x6a   : > { %846 = vmatpush.msrb.mxu2 %v508_v63  ;;  %v678_v63 = vld [vmem:[#allocation2 + $0x568] sm:$0xff]  ;;  %891 = vmatpush.msra.mxu1 %v695_v62 }
  0x6b   : > { %865 = vmatpush.msrb.mxu3 %v610_v0  ;;  %847 = vmatmul.f32.vlgmr.msrb.gmra.mxu2 %v2546_v9  ;;  %v689_v0 = vld [vmem:[#allocation2 + $0x5c0] sm:$0xff] }
  0x6c   : > { %911 = vmatpush.msra.mxu2 %v600_v2  ;;  %873 = vmatpush.msra.mxu0 %v587_v36  ;;  %v683_v2 = vld [vmem:[#allocation2 + $0x590] sm:$0xff]  ;;  %v503_v36 = vld [vmem:[%s500_s27] sm:$0xff] }
  0x6d   : > { %866 = vmatpush.msrb.mxu3 %v604_v1  ;;  %v672_v1 = vld [vmem:[#allocation2 + $0x538] sm:$0xff]  ;;  %892 = vmatpush.msra.mxu1 %v689_v0  ;;  %vm504_vm1 = vcmp.ne.s32.totalorder %v503_v36, 0 }
  0x6e   : > { %867 = vmatmul.f32.vlgmr.msrb.gmra.mxu3 %v2549_v14  ;;  %912 = vmatpush.msra.mxu2 %v594_v3  ;;  %v666_v3 = vld [vmem:[#allocation2 + $0x508] sm:$0xff] }
  0x6f   : > { %931 = vmatpush.msra.mxu3 %v696_v40  ;;  %874 = vmatpush.msra.mxu0 %v581_v39 }
  0x70   : > { %913 = vmatpush.msra.mxu2 %v588_v4  ;;  %v677_v4 = vld [vmem:[#allocation2 + $0x560] sm:$0xff]  ;;  %893 = vmatpush.msra.mxu1 %v683_v2 }
  0x71   : > { %932 = vmatpush.msra.mxu3 %v690_v41  ;;  %875 = vmatpush.msra.mxu0 %v575_v42 }
  0x72   : > { %914 = vmatpush.msra.mxu2 %v582_v5  ;;  %v660_v5 = vld [vmem:[#allocation2 + $0x4d8] sm:$0xff]  ;;  %894 = vmatpush.msra.mxu1 %v677_v4 }
  0x73   : > { %876 = vmatpush.msra.mxu0 %v569_v45  ;;  %933 = vmatpush.msra.mxu3 %v684_v61  ;;  %v703_v45 = vperm.slane %v2563_v22, 4 }
  0x74   : > { %915 = vmatpush.msra.mxu2 %v576_v6  ;;  %v671_v6 = vld [vmem:[#allocation2 + $0x530] sm:$0xff] }
  0x75   : > { %877 = vmatpush.msra.mxu0 %v563_v46  ;;  %934 = vmatpush.msra.mxu3 %v678_v63 }
  0x76   : > { %916 = vmatpush.msra.mxu2 %v570_v7  ;;  %v654_v7 = vld [vmem:[#allocation2 + $0x4a8] sm:$0xff]  ;;  %895 = vmatpush.msra.mxu1 %v671_v6 }
  0x77   : > { %878 = vmatpush.msra.mxu0 %v557_v50  ;;  %935 = vmatpush.msra.mxu3 %v672_v1 }
  0x78   : > { %917 = vmatpush.msra.mxu2 %v564_v8  ;;  %v648_v8 = vld [vmem:[#allocation2 + $0x478] sm:$0xff] }
  0x79   : > { %879 = vmatpush.msra.mxu0 %v551_v53  ;;  %936 = vmatpush.msra.mxu3 %v666_v3 }
  0x7a   : > { %918 = vmatpush.msra.mxu2 %v558_v10  ;;  %v659_v10 = vld [vmem:[#allocation2 + $0x4d0] sm:$0xff] }
  0x7b   : > { %880 = vmatpush.msra.mxu0 %v545_v54  ;;  %937 = vmatpush.msra.mxu3 %v660_v5 }
  0x7c   : > { %919 = vmatpush.msra.mxu2 %v552_v11  ;;  %v642_v11 = vld [vmem:[#allocation2 + $0x448] sm:$0xff] }
  0x7d   : > { %881 = vmatpush.msra.mxu0 %v539_v55  ;;  %938 = vmatpush.msra.mxu3 %v654_v7 }
  0x7e   : > { %920 = vmatpush.msra.mxu2 %v546_v12  ;;  %v653_v12 = vld [vmem:[#allocation2 + $0x4a0] sm:$0xff] }
  0x7f   : > { %882 = vmatpush.msra.mxu0 %v533_v56  ;;  %939 = vmatpush.msra.mxu3 %v648_v8 }
  0x80   : > { %921 = vmatpush.msra.mxu2 %v540_v13  ;;  %v636_v13 = vld [vmem:[#allocation2 + $0x418] sm:$0xff] }
  0x81   : > { %883 = vmatpush.msra.mxu0 %v527_v57  ;;  %940 = vmatpush.msra.mxu3 %v642_v11 }
  0x82   : > { %922 = vmatpush.msra.mxu2 %v534_v15  ;;  %v647_v15 = vld [vmem:[#allocation2 + $0x470] sm:$0xff] }
  0x83   : > { %884 = vmatpush.msra.mxu0 %v521_v58  ;;  %941 = vmatpush.msra.mxu3 %v636_v13 }
  0x84   : > { %923 = vmatpush.msra.mxu2 %v528_v16  ;;  %v630_v16 = vld [vmem:[#allocation2 + $0x3e8] sm:$0xff] }
  0x85   : > { %885 = vmatpush.msra.mxu0 %v515_v59  ;;  %942 = vmatpush.msra.mxu3 %v630_v16 }
  0x86   : > { %924 = vmatpush.msra.mxu2 %v522_v17  ;;  %v641_v17 = vld [vmem:[#allocation2 + $0x440] sm:$0xff] }
  0x87   : > { %886 = vmatpush.msra.mxu0 %v509_v60 }
  0x88   : > { %925 = vmatpush.msra.mxu2 %v516_v18  ;;  %887 = vmatmul.f32.vlgmr.msra.gmra.mxu0 %v2546_v9  ;;  %v624_v18 = vld [vmem:[#allocation2 + $0x3b8] sm:$0xff] }
  0x89   : > { %943 = vmatpush.msra.mxu3 %v624_v18 }
  0x8a   : > { %926 = vmatpush.msra.mxu2 %v510_v19  ;;  %v635_v19 = vld [vmem:[#allocation2 + $0x410] sm:$0xff] }
  0x8b   : > { %927 = vmatmul.f32.vlgmr.msra.gmra.mxu2 %v2546_v9  ;;  %v665_v9 = vld [vmem:[#allocation2 + $0x500] sm:$0xff] }
  0x8c   : > { %896 = vmatpush.msra.mxu1 %v665_v9 }
  0x8e   : > { %897 = vmatpush.msra.mxu1 %v659_v10 }
  0x90   : > { %898 = vmatpush.msra.mxu1 %v653_v12  ;;  %v704_v12 = vperm.slane %v2563_v22, 5 }
  0x92   : > { %899 = vmatpush.msra.mxu1 %v647_v15 }
  0x94   : > { %900 = vmatpush.msra.mxu1 %v641_v17 }
  0x96   : > { %901 = vmatpush.msra.mxu1 %v635_v19 }
  0xc4   : > { %v728_v20 = vpop.f32.mrf.mxu0 }
  0xc5   : > { %v729_v25 = vadd.f32 %v728_v20, %v699_v23  ;;  %v618_v20 = vld [vmem:[#allocation2 + $0x388] sm:$0xff]  ;;  %v612_v23 = vld [vmem:[#allocation2 + $0x358] sm:$0xff] }
  0xc6   : > { %944 = vmatpush.msra.mxu3 %v618_v20 }
  0xc7   : > { %v748_v21 = vpop.f32.mrf.mxu1 }
  0xc8   : > { %v749_v29 = vadd.f32 %v748_v21, %v729_v25  ;;  %v629_v21 = vld [vmem:[#allocation2 + $0x3e0] sm:$0xff]  ;;  %945 = vmatpush.msra.mxu3 %v612_v23  ;;  %v606_v25 = vld [vmem:[#allocation2 + $0x328] sm:$0xff] }
  0xc9   : > { %902 = vmatpush.msra.mxu1 %v629_v21 }
  0xca   : > { %v951_v32 = vmul.f32 0.17677669, %v749_v29  ;;  %946 = vmatpush.msra.mxu3 %v606_v25  ;;  %v605_v29 = vld [vmem:[#allocation2 + $0x320] sm:$0xff] }
  0xcb   : > { %947 = vmatmul.f32.vlgmr.msra.gmra.mxu3 %v2549_v14 }
  0xe2   : > { %v808_v26 = vpop.f32.mrf.mxu0  ;;  %v768_v35 = vpop.f32.mrf.mxu2 }
  0xe3   : > { %v828_v27 = vpop.f32.mrf.mxu1  ;;  %v809_v28 = vadd.f32 %v808_v26, %v701_v24  ;;  %v769_v37 = vadd.f32 %v768_v35, %v700_v31  ;;  %v788_v38 = vpop.f32.mrf.mxu3  ;;  %v623_v24 = vld [vmem:[#allocation2 + $0x3b0] sm:$0xff]  ;;  %v617_v26 = vld [vmem:[#allocation2 + $0x380] sm:$0xff] }
  0xe4   : > { %903 = vmatpush.msra.mxu1 %v623_v24 }
  0xe5   : > { %v829_v30 = vadd.f32 %v828_v27, %v809_v28  ;;  %v789_v43 = vadd.f32 %v788_v38, %v769_v37  ;;  %v611_v27 = vld [vmem:[#allocation2 + $0x350] sm:$0xff] }
  0xe6   : > { %904 = vmatpush.msra.mxu1 %v617_v26 }
  0xe7   : > { %1088 = vrot.lane.b32.xlu2 %v829_v30, %s2384_s24  ;;  %1156 = vrot.lane.b32.xlu1 %v829_v30, %s2385_s30  ;;  %v2576_v47 = vmul.f32 0.17677669, %v789_v43 }
  0xe8   : > { %1019 = vrot.lane.b32.xlu0 %v829_v30, %s2386_s15  ;;  %2036 = vmatpush.xpose.msk.msrb.mxu2 %vm953_vm0, %v829_v30 }
  0xe9   : > { %905 = vmatpush.msra.mxu1 %v611_v27 }
  0xeb   : > { %2037 = vmatmul.msk.f32.vlgmr.msrb.gmra.mxu2 %vm953_vm0, %v951_v32  ;;  %906 = vmatpush.msra.mxu1 %v605_v29 }
  0xec   : > { %907 = vmatmul.f32.vlgmr.msra.gmra.mxu1 %v2549_v14 }
  0xee   : > { %v848_v48 = vpop.f32.mrf.mxu2 }
  0xef   : > { %1154 = vrot.lane.b32.xlu1 %v951_v32, %s2385_s30  ;;  %v849_v49 = vadd.f32 %v848_v48, %v702_v44 }
  0xf0   : > { %1017 = vrot.lane.b32.xlu0 %v951_v32, %s2386_s15 }
  0xf1   : > { %v868_v51 = vpop.f32.mrf.mxu3 }
  0xf2   : > { %v2579_v52 = vadd.f32 %v868_v51, %v849_v49 }
  0xf4   : > { %1287 = vrot.lane.b32.xlu2 %v2579_v52, %s2386_s15 }
  0xf7   : > { %1086 = vrot.lane.b32.xlu1 %v951_v32, %s2384_s24 }
  0xf8   : > { %1285 = vrot.lane.b32.xlu0 %v2576_v47, %s2386_s15 }
  0xfc   : > { %1424 = vrot.lane.b32.xlu2 %v2579_v52, %s2385_s30 }
  0xff   : > { %1356 = vrot.lane.b32.xlu1 %v2579_v52, %s2384_s24 }
 0x100   : > { %1422 = vrot.lane.b32.xlu0 %v2576_v47, %s2385_s30 }
 0x104   : > { %1354 = vrot.lane.b32.xlu2 %v2576_v47, %s2384_s24 }
 0x105   : > { %v888_v46 = vpop.f32.mrf.mxu0 }
 0x106   : > { %v889_v48 = vadd.f32 %v888_v46, %v703_v45 }
 0x10e   : > { %v2603_v35 = vpop.f32.mrf.mxu2 }
 0x10f   : > { %v929_v13 = vadd.f32 %v2603_v35, %v704_v12 }
 0x141   : > { %v1089_v28 = vpop.permute.xlu2 %1088 }
 0x142   : > { %2043 = vmatpush.xpose.msk.msrb.mxu0 %vm953_vm0, %v1089_v28 }
 0x146   : > { %2051 = vmatpush.xpose.msk.msra.mxu0 %vm953_vm0, %v2579_v52 }
 0x14e   : > { %v1288_v32 = vpop.permute.xlu2 %1287  ;;  %v948_v15 = vpop.f32.mrf.mxu3 }
 0x14f   : > { %v2644_v16 = vadd.f32 %v948_v15, %v929_v13 }
 0x156   : > { %v1425_v37 = vpop.permute.xlu2 %1424 }
 0x159   : > { %v1157_v30 = vpop.permute.xlu1 %1156 }
 0x15a   : > { %v1020_v31 = vpop.permute.xlu0 %1019 }
 0x15b   : > { %2039 = vmatpush.xpose.msk.msra.mxu2 %vm953_vm0, %v1020_v31 }
 0x15e   : > { %v1355_v44 = vpop.permute.xlu2 %1354 }
 0x15f   : > { %2047 = vmatpush.xpose.msk.msrb.mxu2 %vm953_vm0, %v1157_v30 }
 0x161   : > { %v1155_v33 = vpop.permute.xlu1 %1154 }
 0x162   : > { %v1018_v34 = vpop.permute.xlu0 %1017 }
 0x163   : > { %2040 = vmatmul.msk.f32.vlgmr.msra.gmra.mxu2 %vm953_vm0, %v1018_v34 }
 0x164   : > { %2055 = vmatpush.xpose.msk.msra.mxu2 %vm953_vm0, %v1288_v32 }
 0x169   : > { %v1087_v14 = vpop.permute.xlu1 %1086  ;;  %v908_v49 = vpop.f32.mrf.mxu1 }
 0x16a   : > { %2044 = vmatmul.msk.f32.vlgmr.msrb.gmra.mxu0 %vm953_vm0, %v1087_v14  ;;  %v1286_v39 = vpop.permute.xlu0 %1285  ;;  %v2621_v50 = vadd.f32 %v908_v49, %v889_v48 }
 0x16b   : > { %2048 = vmatmul.msk.f32.vlgmr.msrb.gmra.mxu2 %vm953_vm0, %v1155_v33 }
 0x16c   : > { %2063 = vmatpush.xpose.msk.msrb.mxu2 %vm953_vm0, %v1425_v37  ;;  %1012 = vmatpush.msrb.mxu3 %v2621_v50  ;;  %v2155_v17 = vpack.i.bf16 %v2644_v16, %v2621_v50 }
 0x16e   : > { %v977_v38 = vpop.f32.mrf.mxu2 }
 0x16f   : > { %v980_v40 = vsel %vm504_vm1, -1e+09, %v977_v38 }
 0x170   : > { %v982_v41 = vsel %vm981_vm2, %v980_v40, -inf }
 0x171   : > { %983 = vmax.xlane.f32.xlu0 %v982_v41  ;;  %v1357_v42 = vpop.permute.xlu1 %1356 }
 0x172   : > { %2052 = vmatmul.msk.f32.vlgmr.msra.gmra.mxu0 %vm953_vm0, %v2576_v47  ;;  %v1423_v43 = vpop.permute.xlu0 %1422 }
 0x173   : > { %2056 = vmatmul.msk.f32.vlgmr.msra.gmra.mxu2 %vm953_vm0, %v1286_v39  ;;  %2059 = vmatpush.xpose.msk.msrb.mxu0 %vm953_vm0, %v1357_v42 }
 0x17a   : > { %2060 = vmatmul.msk.f32.vlgmr.msrb.gmra.mxu0 %vm953_vm0, %v1355_v44 }
 0x17b   : > { %2064 = vmatmul.msk.f32.vlgmr.msrb.gmra.mxu2 %vm953_vm0, %v1423_v43 }
 0x1e4   : > { %v984_v47 = vpop.xlane.xlu0 %983 }
 0x1e5   : > { %v985_v54 = vsub.f32 %v980_v40, %v984_v47 }
 0x1e6   : > { %v1042_v51 = vpop.f32.mrf.mxu2 }
 0x1e7   : > { %v1045_v52 = vsel %vm504_vm1, -1e+09, %v1042_v51  ;;  %v1111_v53 = vpop.f32.mrf.mxu0  ;;  %v986_v58 = vmul.f32 1.442695, %v985_v54 }
 0x1e8   : > { %v1114_v55 = vsel %vm504_vm1, -1e+09, %v1111_v53  ;;  %v1046_v56 = vsel %vm981_vm2, %v1045_v52, -inf }
 0x1e9   : > { %1047 = vmax.xlane.f32.xlu1 %v1046_v56  ;;  %v1115_v57 = vsel %vm981_vm2, %v1114_v55, -inf  ;;  %2176 = vpow2.f32 %v986_v58 }
 0x1ea   : > { %1116 = vmax.xlane.f32.xlu2 %v1115_v57 }
 0x1ee   : > { %v1179_v59 = vpop.f32.mrf.mxu2 }
 0x1ef   : > { %v1182_v60 = vsel %vm504_vm1, -1e+09, %v1179_v59  ;;  %v1245_v61 = vpop.f32.mrf.mxu0  ;;  %v2177_v1 = vpop.eup %2176 }
 0x1f0   : > { %v1248_v62 = vsel %vm504_vm1, -1e+09, %v1245_v61  ;;  %v1183_v63 = vsel %vm981_vm2, %v1182_v60, -inf  ;;  %v988_v6 = vsel %vm981_vm2, %v2177_v1, 0.0 }
 0x1f1   : > { %v1249_v0 = vsel %vm981_vm2, %v1248_v62, -inf }
 0x1f2   : > { %1184 = vmax.xlane.f32.xlu2 %v1183_v63  ;;  %1250 = vmax.xlane.f32.xlu1 %v1249_v0 }
 0x1f6   : > { %v1310_v2 = vpop.f32.mrf.mxu2 }
 0x1f7   : > { %v1379_v3 = vpop.f32.mrf.mxu0  ;;  %v1313_v7 = vsel %vm504_vm1, -1e+09, %v1310_v2 }
 0x1f8   : > { %v2633_v4 = vsel %vm504_vm1, -1e+09, %v1379_v3  ;;  %v1314_v10 = vsel %vm981_vm2, %v1313_v7, -inf }
 0x1f9   : > { %v1383_v5 = vsel %vm981_vm2, %v2633_v4, -inf }
 0x1fa   : > { %1384 = vmax.xlane.f32.xlu0 %v1383_v5  ;;  %989 = vadd.xlane.f32.xlu1 %v988_v6 }
 0x1fe   : > { %v1447_v9 = vpop.f32.mrf.mxu2 }
 0x1ff   : > { %v1450_v8 = vsel %vm504_vm1, -1e+09, %v1447_v9 }
 0x200   : > { %v1451_v11 = vsel %vm981_vm2, %v1450_v8, -inf }
 0x201   : > { %1452 = vmax.xlane.f32.xlu2 %v1451_v11 }
 0x202   : > { %1315 = vmax.xlane.f32.xlu0 %v1314_v10 }
 0x213   : > { %2156 = vrot.lane.b32.xlu1 %v2155_v17, %s2386_s15 }
 0x216   : > { %1128 = vrot.lane.b32.xlu0 %v2621_v50, %s2384_s24 }
 0x25c   : > { %v1048_v18 = vpop.xlane.xlu1 %1047 }
 0x25d   : > { %v1117_v19 = vpop.xlane.xlu2 %1116  ;;  %v1049_v21 = vsub.f32 %v1045_v52, %v1048_v18 }
 0x25e   : > { %v1118_v20 = vsub.f32 %v1114_v55, %v1117_v19 }
 0x25f   : > { %v1050_v22 = vmul.f32 1.442695, %v1049_v21 }
 0x260   : > { %v1119_v23 = vmul.f32 1.442695, %v1118_v20 }
 0x262   : > { %2178 = vpow2.f32 %v1119_v23 }
 0x263   : > { %2180 = vpow2.f32 %v1050_v22 }
 0x265   : > { %v1251_v24 = vpop.xlane.xlu1 %1250  ;;  %v1185_v25 = vpop.xlane.xlu2 %1184 }
 0x266   : > { %v1252_v26 = vsub.f32 %v1248_v62, %v1251_v24  ;;  %v1186_v29 = vsub.f32 %v1182_v60, %v1185_v25 }
 0x268   : > { %v2179_v27 = vpop.eup %2178  ;;  %v1253_v28 = vmul.f32 1.442695, %v1252_v26  ;;  %v1187_v31 = vmul.f32 1.442695, %v1186_v29 }
 0x269   : > { %v1121_v30 = vsel %vm981_vm2, %v2179_v27, 0.0  ;;  %v2181_v34 = vpop.eup %2180 }
 0x26a   : > { %1122 = vadd.xlane.f32.xlu2 %v1121_v30  ;;  %2182 = vpow2.f32 %v1253_v28  ;;  %v1052_v14 = vsel %vm981_vm2, %v2181_v34, 0.0 }
 0x26d   : > { %v990_v32 = vpop.xlane.xlu1 %989  ;;  %v1385_v33 = vpop.xlane.xlu0 %1384 }
 0x26e   : > { %2184 = vrcp.f32 %v990_v32  ;;  %v1386_v55 = vsub.f32 %v2633_v4, %v1385_v33  ;;  %v1584_v32 = vld [vmem:[#allocation5 + $0x1f0] sm:$0xff]  ;;  %v1553_v33 = vld [vmem:[#allocation5 + $0xf8] sm:$0xff] }
 0x26f   : > { %2186 = vpow2.f32 %v1187_v31  ;;  %v1552_v31 = vld [vmem:[#allocation5 + $0xf0] sm:$0xff]  ;;  %1632 = vmatpush.msra.mxu2 %v1553_v33 }
 0x270   : > { %v2183_v35 = vpop.eup %2182  ;;  %v1387_v56 = vmul.f32 1.442695, %v1386_v55  ;;  %1592 = vmatpush.msra.mxu0 %v1552_v31  ;;  %v1540_v55 = vld [vmem:[#allocation5 + $0x90] sm:$0xff]  ;;  %v1523_v31 = vld [vmem:[#allocation5 + $0x8] sm:$0xff] }
 0x271   : > { %v1255_v36 = vsel %vm981_vm2, %v2183_v35, 0.0 }
 0x272   : > { %1053 = vadd.xlane.f32.xlu2 %v1052_v14  ;;  %1256 = vadd.xlane.f32.xlu0 %v1255_v36  ;;  %v1582_v14 = vld [vmem:[#allocation5 + $0x1e0] sm:$0xff]  ;;  %v1551_v36 = vld [vmem:[#allocation5 + $0xe8] sm:$0xff] }
 0x273   : > { %1633 = vmatpush.msra.mxu2 %v1551_v36 }
 0x274   : > { %v2185_v37 = vpop.eup %2184  ;;  %v1453_v38 = vpop.xlane.xlu2 %1452 }
 0x275   : > { %v992_v39 = vmul.f32 %v2185_v37, %v2177_v1  ;;  %v1454_v40 = vsub.f32 %v1450_v8, %v1453_v38  ;;  %v1316_v41 = vpop.xlane.xlu0 %1315  ;;  %v2187_v43 = vpop.eup %2186  ;;  %v1583_v37 = vld [vmem:[#allocation5 + $0x1e8] sm:$0xff]  ;;  %v1548_v38 = vld [vmem:[#allocation5 + $0xd0] sm:$0xff] }
 0x276   : > { %v1317_v42 = vsub.f32 %v1313_v7, %v1316_v41  ;;  %v1189_v46 = vsel %vm981_vm2, %v2187_v43, 0.0  ;;  %v1581_v41 = vld [vmem:[#allocation5 + $0x1d8] sm:$0xff] }
 0x277   : > { %v1455_v44 = vmul.f32 1.442695, %v1454_v40  ;;  %2038 = vmatmul.msk.f32.vlgmr.msrb.gmra.mxu3 %vm981_vm2, %v992_v39  ;;  %993 = vst.msk [vmem:[%s2659_s17] sm:$0xff] %vm981_vm2, %v992_v39  ;;  %v1580_v39 = vld [vmem:[#allocation5 + $0x1d0] sm:$0xff]  ;;  %v1549_v40 = vld [vmem:[#allocation5 + $0xd8] sm:$0xff] }
 0x278   : > { %v1318_v45 = vmul.f32 1.442695, %v1317_v42  ;;  %v1546_v42 = vld [vmem:[#allocation5 + $0xc0] sm:$0xff]  ;;  %1634 = vmatpush.msra.mxu2 %v1549_v40 }
 0x279   : > { %2188 = vpow2.f32 %v1455_v44  ;;  %v1547_v44 = vld [vmem:[#allocation5 + $0xc8] sm:$0xff] }
 0x27a   : > { %2190 = vpow2.f32 %v1318_v45  ;;  %1190 = vadd.xlane.f32.xlu0 %v1189_v46  ;;  %v1579_v45 = vld [vmem:[#allocation5 + $0x1c8] sm:$0xff]  ;;  %v1544_v46 = vld [vmem:[#allocation5 + $0xb0] sm:$0xff]  ;;  %1635 = vmatpush.msra.mxu2 %v1547_v44 }
 0x27b   : > { %2192 = vpow2.f32 %v1387_v56  ;;  %v1572_v56 = vld [vmem:[#allocation5 + $0x190] sm:$0xff] }
 0x27f   : > { %v2189_v48 = vpop.eup %2188 }
 0x280   : > { %v2191_v49 = vpop.eup %2190  ;;  %v1457_v47 = vsel %vm981_vm2, %v2189_v48, 0.0 }
 0x281   : > { %1458 = vadd.xlane.f32.xlu1 %v1457_v47  ;;  %v1320_v51 = vsel %vm981_vm2, %v2191_v49, 0.0  ;;  %v2193_v57 = vpop.eup %2192  ;;  %v1577_v47 = vld [vmem:[#allocation5 + $0x1b8] sm:$0xff] }
 0x282   : > { %1321 = vadd.xlane.f32.xlu0 %v1320_v51  ;;  %v1389_v58 = vsel %vm981_vm2, %v2193_v57, 0.0  ;;  %v1542_v51 = vld [vmem:[#allocation5 + $0xa0] sm:$0xff] }
 0x285   : > { %v2157_v52 = vpop.permute.xlu1 %2156 }
 0x286   : > { %v2158_v53 = vunpack.i.l.bf16 %v2157_v52  ;;  %v2159_v3 = vunpack.i.h.bf16 %v2157_v52  ;;  %v1574_v52 = vld [vmem:[#allocation5 + $0x1a0] sm:$0xff] }
 0x288   : > { %1081 = vmatpush.msra.mxu3 %v2158_v53  ;;  %v1129_v54 = vpop.permute.xlu0 %1128  ;;  %v1543_v53 = vld [vmem:[#allocation5 + $0xa8] sm:$0xff] }
 0x289   : > { %1149 = vmatpush.msrb.mxu1 %v1129_v54  ;;  %v1575_v54 = vld [vmem:[#allocation5 + $0x1a8] sm:$0xff] }
 0x28a   : > { %1196 = vrot.lane.b32.xlu2 %v2621_v50, %s2385_s30 }
 0x28b   : > { %1280 = vmatpush.msra.mxu1 %v2644_v16 }
 0x296   : > { %1464 = vrot.lane.b32.xlu0 %v2644_v16, %s2385_s30 }
 0x29e   : > { %1396 = vrot.lane.b32.xlu0 %v2644_v16, %s2384_s24 }
 0x2b3   : > { %1390 = vadd.xlane.f32.xlu2 %v1389_v58  ;;  %v1573_v58 = vld [vmem:[#allocation5 + $0x198] sm:$0xff] }
 0x2dd   : > { %v1123_v59 = vpop.xlane.xlu2 %1122 }
 0x2de   : > { %2194 = vrcp.f32 %v1123_v59  ;;  %v1538_v59 = vld [vmem:[#allocation5 + $0x80] sm:$0xff] }
 0x2e4   : > { %v2195_v50 = vpop.eup %2194 }
 0x2e5   : > { %v1125_v60 = vmul.f32 %v2195_v50, %v2179_v27  ;;  %v1054_v61 = vpop.xlane.xlu2 %1053  ;;  %v1257_v62 = vpop.xlane.xlu0 %1256  ;;  %v1570_v50 = vld [vmem:[#allocation5 + $0x180] sm:$0xff] }
 0x2e6   : > { %2196 = vrcp.f32 %v1054_v61  ;;  %v1571_v61 = vld [vmem:[#allocation5 + $0x188] sm:$0xff] }
 0x2e7   : > { %2198 = vrcp.f32 %v1257_v62  ;;  %2046 = vmatmul.msk.f32.vlgmr.msrb.gmra.mxu1 %vm981_vm2, %v1125_v60  ;;  %2045 = vst.msk [vmem:[%s2659_s17 + $0x10] sm:$0xff] %vm981_vm2, %v1125_v60  ;;  %v1539_v60 = vld [vmem:[#allocation5 + $0x88] sm:$0xff]  ;;  %v1536_v62 = vld [vmem:[#allocation5 + $0x70] sm:$0xff] }
 0x2ec   : > { %v2197_v63 = vpop.eup %2196 }
 0x2ed   : > { %v2199_v0 = vpop.eup %2198  ;;  %v1056_v1 = vmul.f32 %v2197_v63, %v2181_v34  ;;  %v1197_v2 = vpop.permute.xlu2 %1196  ;;  %v1585_v34 = vld [vmem:[#allocation5 + $0x1f8] sm:$0xff]  ;;  %v1568_v63 = vld [vmem:[#allocation5 + $0x170] sm:$0xff] }
 0x2ee   : > { %v1259_v4 = vmul.f32 %v2199_v0, %v2183_v35  ;;  %v1191_v5 = vpop.xlane.xlu0 %1190  ;;  %1217 = vmatpush.msrb.mxu3 %v1197_v2  ;;  %v1550_v35 = vld [vmem:[#allocation5 + $0xe0] sm:$0xff]  ;;  %v1537_v0 = vld [vmem:[#allocation5 + $0x78] sm:$0xff] }
 0x2ef   : > { %2200 = vrcp.f32 %v1191_v5  ;;  %2042 = vmatmul.msk.f32.vlgmr.msra.gmra.mxu3 %vm981_vm2, %v1056_v1  ;;  %2041 = vst.msk [vmem:[%s2659_s17 + $0x8] sm:$0xff] %vm981_vm2, %v1056_v1  ;;  %1593 = vmatpush.msra.mxu0 %v1550_v35  ;;  %v1569_v1 = vld [vmem:[#allocation5 + $0x178] sm:$0xff]  ;;  %v1534_v2 = vld [vmem:[#allocation5 + $0x60] sm:$0xff]  ;;  %v1567_v5 = vld [vmem:[#allocation5 + $0x168] sm:$0xff] }
 0x2f0   : > { %2054 = vmatmul.msk.f32.vlgmr.msra.gmra.mxu1 %vm981_vm2, %v1259_v4  ;;  %1349 = vmatpush.msra.mxu3 %v2159_v3  ;;  %2053 = vst.msk [vmem:[%s2659_s17 + $0x20] sm:$0xff] %vm981_vm2, %v1259_v4  ;;  %v1566_v3 = vld [vmem:[#allocation5 + $0x160] sm:$0xff]  ;;  %v1535_v4 = vld [vmem:[#allocation5 + $0x68] sm:$0xff] }
 0x2f1   : > { %1594 = vmatpush.msra.mxu0 %v1548_v38 }
 0x2f3   : > { %1595 = vmatpush.msra.mxu0 %v1546_v42 }
 0x2f4   : > { %v1459_v6 = vpop.xlane.xlu1 %1458 }
 0x2f5   : > { %v2201_v7 = vpop.eup %2200  ;;  %2202 = vrcp.f32 %v1459_v6  ;;  %1596 = vmatpush.msra.mxu0 %v1544_v46  ;;  %v1532_v6 = vld [vmem:[#allocation5 + $0x50] sm:$0xff] }
 0x2f6   : > { %v1193_v9 = vmul.f32 %v2201_v7, %v2187_v43  ;;  %v1322_v8 = vpop.xlane.xlu0 %1321  ;;  %v1578_v43 = vld [vmem:[#allocation5 + $0x1c0] sm:$0xff]  ;;  %v1564_v7 = vld [vmem:[#allocation5 + $0x150] sm:$0xff] }
 0x2f7   : > { %2204 = vrcp.f32 %v1322_v8  ;;  %1597 = vmatpush.msra.mxu0 %v1542_v51  ;;  %v1565_v8 = vld [vmem:[#allocation5 + $0x158] sm:$0xff] }
 0x2f8   : > { %2050 = vmatmul.msk.f32.vlgmr.msrb.gmra.mxu3 %vm981_vm2, %v1193_v9  ;;  %2049 = vst.msk [vmem:[%s2659_s17 + $0x18] sm:$0xff] %vm981_vm2, %v1193_v9  ;;  %v1533_v9 = vld [vmem:[#allocation5 + $0x58] sm:$0xff] }
 0x2f9   : > { %1598 = vmatpush.msra.mxu0 %v1540_v55 }
 0x2fa   : > { %v2696_v20 = vpop.f32.mrf.mxu3 }
 0x2fb   : > { %v2203_v10 = vpop.eup %2202  ;;  %1599 = vmatpush.msra.mxu0 %v1538_v59  ;;  %v2213_v59 = vld [vmem:[%s2543_s19 + $0x8] sm:$0xff] }
 0x2fc   : > { %v1461_v11 = vmul.f32 %v2203_v10, %v2189_v48  ;;  %v1576_v48 = vld [vmem:[#allocation5 + $0x1b0] sm:$0xff]  ;;  %v1530_v10 = vld [vmem:[#allocation5 + $0x40] sm:$0xff] }
 0x2fd   : > { %v2205_v12 = vpop.eup %2204  ;;  %1600 = vmatpush.msra.mxu0 %v1536_v62  ;;  %v1737_v62 = vld [vmem:[%s2917_s8 + $0x78] sm:$0xff] }
 0x2fe   : > { %v1324_v13 = vmul.f32 %v2205_v12, %v2191_v49  ;;  %2065 = vst.msk [vmem:[%s2659_s17 + $0x38] sm:$0xff] %vm981_vm2, %v1461_v11  ;;  %v1545_v49 = vld [vmem:[#allocation5 + $0xb8] sm:$0xff]  ;;  %v1531_v12 = vld [vmem:[#allocation5 + $0x48] sm:$0xff] }
 0x2ff   : > { %1636 = vmatpush.msra.mxu2 %v1545_v49  ;;  %1601 = vmatpush.msra.mxu0 %v1534_v2 }
 0x300   : > { %2058 = vmatmul.msk.f32.vlgmr.msra.gmra.mxu3 %vm981_vm2, %v1324_v13  ;;  %2057 = vst.msk [vmem:[%s2659_s17 + $0x28] sm:$0xff] %vm981_vm2, %v1324_v13  ;;  %v1563_v13 = vld [vmem:[#allocation5 + $0x148] sm:$0xff] }
 0x301   : > { %1637 = vmatpush.msra.mxu2 %v1543_v53  ;;  %1602 = vmatpush.msra.mxu0 %v1532_v6 }
 0x303   : > { %1603 = vmatpush.msra.mxu0 %v1530_v10 }
 0x308   : > { %v1465_v15 = vpop.permute.xlu0 %1464 }
 0x309   : > { %1485 = vmatpush.msrb.mxu3 %v1465_v15  ;;  %v1528_v15 = vld [vmem:[#allocation5 + $0x30] sm:$0xff] }
 0x30a   : > { %2066 = vmatmul.msk.f32.vlgmr.msrb.gmra.mxu3 %vm981_vm2, %v1461_v11  ;;  %v1562_v11 = vld [vmem:[#allocation5 + $0x140] sm:$0xff]  ;;  %1604 = vmatpush.msra.mxu0 %v1528_v15 }
 0x30b   : > { %1652 = vmatpush.msra.mxu3 %v1585_v34 }
 0x30d   : > { %1653 = vmatpush.msra.mxu3 %v1583_v37 }
 0x30f   : > { %1654 = vmatpush.msra.mxu3 %v1581_v41 }
 0x310   : > { %v1397_v16 = vpop.permute.xlu0 %1396 }
 0x311   : > { %1417 = vmatpush.msrb.mxu1 %v1397_v16  ;;  %1655 = vmatpush.msra.mxu3 %v1579_v45  ;;  %v1560_v16 = vld [vmem:[#allocation5 + $0x130] sm:$0xff] }
 0x313   : > { %1612 = vmatpush.msra.mxu1 %v1584_v32  ;;  %1656 = vmatpush.msra.mxu3 %v1577_v47  ;;  %v1555_v32 = vld [vmem:[#allocation5 + $0x108] sm:$0xff] }
 0x315   : > { %1613 = vmatpush.msra.mxu1 %v1582_v14  ;;  %1657 = vmatpush.msra.mxu3 %v1575_v54 }
 0x317   : > { %1614 = vmatpush.msra.mxu1 %v1580_v39  ;;  %1658 = vmatpush.msra.mxu3 %v1573_v58 }
 0x319   : > { %1615 = vmatpush.msra.mxu1 %v1578_v43  ;;  %1659 = vmatpush.msra.mxu3 %v1571_v61  ;;  %v2387_v61 = vmov 256.0  }
 0x31b   : > { %1616 = vmatpush.msra.mxu1 %v1576_v48  ;;  %1660 = vmatpush.msra.mxu3 %v1569_v1  ;;  %v1586_v48 = vld [vmem:[%s2914_s5] sm:$0x3]  ;;  %v1752_v1 = vld [vmem:[%s2917_s8 + $0xf0] sm:$0xff] }
 0x31d   : > { %1617 = vmatpush.msra.mxu1 %v1574_v52  ;;  %1661 = vmatpush.msra.mxu3 %v1567_v5 }
 0x31f   : > { %1618 = vmatpush.msra.mxu1 %v1572_v56  ;;  %1662 = vmatpush.msra.mxu3 %v1565_v8 }
 0x321   : > { %1619 = vmatpush.msra.mxu1 %v1570_v50  ;;  %1663 = vmatpush.msra.mxu3 %v1563_v13 }
 0x323   : > { %1620 = vmatpush.msra.mxu1 %v1568_v63  ;;  %v1753_v63 = vld [vmem:[%s2917_s8 + $0xf8] sm:$0xff] }
 0x325   : > { %1621 = vmatpush.msra.mxu1 %v1566_v3 }
 0x326   : > { %v1391_v17 = vpop.xlane.xlu2 %1390 }
 0x327   : > { %2206 = vrcp.f32 %v1391_v17  ;;  %1622 = vmatpush.msra.mxu1 %v1564_v7  ;;  %v1529_v17 = vld [vmem:[#allocation5 + $0x38] sm:$0xff] }
 0x328   : > { %2208 = vrcp.f32 %v2387_v61 }
 0x329   : > { %1623 = vmatpush.msra.mxu1 %v1562_v11 }
 0x32b   : > { %1624 = vmatpush.msra.mxu1 %v1560_v16  ;;  %v1735_v16 = vld [vmem:[%s2917_s8 + $0x68] sm:$0xff] }
 0x32d   : > { %v2207_v18 = vpop.eup %2206 }
 0x32e   : > { %v1393_v19 = vmul.f32 %v2207_v18, %v2193_v57  ;;  %v1541_v57 = vld [vmem:[#allocation5 + $0x98] sm:$0xff]  ;;  %v2209_v2 = vpop.eup %2208 }
 0x32f   : > { %1638 = vmatpush.msra.mxu2 %v1541_v57  ;;  %v1561_v18 = vld [vmem:[#allocation5 + $0x138] sm:$0xff]  ;;  %v2212_v57 = vld [vmem:[%s2543_s19] sm:$0xff]  ;;  %v1678_v3 = vmul.f32 256.0, %v2209_v2  ;;  %vm1682_vm5 = vweird.f32 %v2209_v2 }
 0x330   : > { %2062 = vmatmul.msk.f32.vlgmr.msrb.gmra.mxu1 %vm981_vm2, %v1393_v19  ;;  %2061 = vst.msk [vmem:[%s2659_s17 + $0x30] sm:$0xff] %vm981_vm2, %v1393_v19  ;;  %v1526_v19 = vld [vmem:[#allocation5 + $0x20] sm:$0xff]  ;;  %1664 = vmatpush.msra.mxu3 %v1561_v18  ;;  %s2294_s17 = scalar_lea.hbm %s2922_s13, 128 }
 0x331   : > { %1639 = vmatpush.msra.mxu2 %v1539_v60  ;;  %1605 = vmatpush.msra.mxu0 %v1526_v19  ;;  %v1734_v18 = vld [vmem:[%s2917_s8 + $0x60] sm:$0xff] }
 0x332   : > { %v1750_v19 = vld [vmem:[%s2917_s8 + $0xe0] sm:$0xff] }
 0x333   : > { %1640 = vmatpush.msra.mxu2 %v1537_v0  ;;  %v1736_v0 = vld [vmem:[%s2917_s8 + $0x70] sm:$0xff] }
 0x335   : > { %1641 = vmatpush.msra.mxu2 %v1535_v4  ;;  %v1679_v4 = vsub.f32 1.0, %v1678_v3  ;;  %v1803_v3 = vld [vmem:[%s2919_s10 + $0x20] sm:$0xff] }
 0x337   : > { %1642 = vmatpush.msra.mxu2 %v1533_v9  ;;  %v1680_v5 = vmul.f32 %v2209_v2, %v1679_v4  ;;  %v1804_v4 = vld [vmem:[%s2919_s10 + $0x28] sm:$0xff] }
 0x339   : > { %1643 = vmatpush.msra.mxu2 %v1531_v12  ;;  %v1681_v6 = vadd.f32 %v2209_v2, %v1680_v5  ;;  %v1801_v5 = vld [vmem:[%s2919_s10 + $0x10] sm:$0xff] }
 0x33b   : > { %1644 = vmatpush.msra.mxu2 %v1529_v17  ;;  %v2724_v7 = vsel %vm1682_vm5, %v2209_v2, %v1681_v6  ;;  %v1751_v17 = vld [vmem:[%s2917_s8 + $0xe8] sm:$0xff]  ;;  %v1802_v6 = vld [vmem:[%s2919_s10 + $0x18] sm:$0xff] }
 0x364   : > { %v1151_v27 = vpop.f32.mrf.mxu1 }
 0x36d   : > { %v2700_v28 = vpop.f32.mrf.mxu1 }
 0x372   : > { %v1083_v21 = vpop.f32.mrf.mxu3 }
 0x37b   : > { %v1219_v23 = vpop.f32.mrf.mxu3 }
 0x383   : > { %v1351_v22 = vpop.f32.mrf.mxu3 }
 0x384   : > { %v2160_v24 = vpack.i.bf16 %v1351_v22, %v1083_v21  ;;  %v1558_v21 = vld [vmem:[#allocation5 + $0x120] sm:$0xff]  ;;  %v1559_v22 = vld [vmem:[#allocation5 + $0x128] sm:$0xff] }
 0x385   : > { %1625 = vmatpush.msra.mxu1 %v1558_v21  ;;  %1665 = vmatpush.msra.mxu3 %v1559_v22  ;;  %v1733_v21 = vld [vmem:[%s2917_s8 + $0x58] sm:$0xff]  ;;  %v1732_v22 = vld [vmem:[%s2917_s8 + $0x50] sm:$0xff] }
 0x386   : > { %2161 = vrot.lane.b32.xlu0 %v2160_v24, %s2385_s30  ;;  %v1524_v24 = vld [vmem:[#allocation5 + $0x10] sm:$0xff] }
 0x387   : > { %1606 = vmatpush.msra.mxu0 %v1524_v24  ;;  %v1748_v24 = vld [vmem:[%s2917_s8 + $0xd0] sm:$0xff] }
 0x38d   : > { %v1487_v25 = vpop.f32.mrf.mxu3 }
 0x38e   : > { %v2170_v26 = vpack.i.bf16 %v1487_v25, %v1219_v23  ;;  %v1527_v23 = vld [vmem:[#allocation5 + $0x28] sm:$0xff]  ;;  %v1556_v25 = vld [vmem:[#allocation5 + $0x110] sm:$0xff] }
 0x38f   : > { %1645 = vmatpush.msra.mxu2 %v1527_v23  ;;  %1626 = vmatpush.msra.mxu1 %v1556_v25  ;;  %v1749_v23 = vld [vmem:[%s2917_s8 + $0xd8] sm:$0xff]  ;;  %v1731_v25 = vld [vmem:[%s2917_s8 + $0x48] sm:$0xff] }
 0x390   : > { %2171 = vrot.lane.b32.xlu0 %v2170_v26, %s2386_s15  ;;  %v1525_v26 = vld [vmem:[#allocation5 + $0x18] sm:$0xff]  ;;  %s1890_s15 = scalar_lea.hbm %s2922_s13, %s2079_s23 }
 0x391   : > { %1646 = vmatpush.msra.mxu2 %v1525_v26  ;;  %v1747_v26 = vld [vmem:[%s2917_s8 + $0xc8] sm:$0xff]  ;;  %s1893_s16 = sshll.u32 %s1890_s15, 4  ;;  %s1894_s16 = int_to_ptr.hbm [resolvable:$true] %s1893_s16 }
 0x392   : > { %s2288_s22 = sshra.s32 %s1894_s16, 4  ;;  %s2289_s22 = int_to_ptr.hbm [resolvable:$true] %s2288_s22 }
 0x393   : > { %1647 = vmatpush.msra.mxu2 %v1523_v31  ;;  %v1745_v31 = vld [vmem:[%s2917_s8 + $0xb8] sm:$0xff]  ;;  %s2290_s19 = scalar_lea.hbm %s2289_s22, 64  ;;  %p2295_p3 = scmp.lt.s32.totalorder %s2289_s22, %s2922_s13 }
 0x394   : > { %p2291_p0 = scmp.ne.s32.totalorder %s2289_s22, %s2290_s19  ;;  %p2296_p4 = scmp.lt.s32.totalorder %s2294_s17, %s2290_s19 }
 0x396   : > { %p2292_p1 = pnand %p2291_p0, %p2498_p5  ;;  %p2297_p7 = por %p2296_p4, %p2295_p3 }
 0x398   : > { %p2293_p2 = pneg %p2292_p1 }
 0x39a   : > { %p2298_p8 = pnand %p2297_p7, %p2293_p2 }
 0x3ad   : > { %v1419_v29 = vpop.f32.mrf.mxu1 }
 0x3ae   : > { %v2165_v30 = vpack.i.bf16 %v1419_v29, %v1151_v27  ;;  %v1557_v27 = vld [vmem:[#allocation5 + $0x118] sm:$0xff]  ;;  %v1522_v29 = vld [vmem:[#allocation5] sm:$0xff] }
 0x3af   : > { %1666 = vmatpush.msra.mxu3 %v1557_v27  ;;  %1607 = vmatpush.msra.mxu0 %v1522_v29  ;;  %v1730_v27 = vld [vmem:[%s2917_s8 + $0x40] sm:$0xff] }
 0x3b0   : > { %2166 = vrot.lane.b32.xlu1 %v2165_v30, %s2384_s24  ;;  %v1554_v30 = vld [vmem:[#allocation5 + $0x100] sm:$0xff] }
 0x3b1   : > { %1627 = vmatpush.msra.mxu1 %v1554_v30  ;;  %1667 = vmatpush.msra.mxu3 %v1555_v32  ;;  %v1746_v29 = vld [vmem:[%s2917_s8 + $0xc0] sm:$0xff]  ;;  %v1729_v30 = vld [vmem:[%s2917_s8 + $0x38] sm:$0xff]  ;;  %v1728_v32 = vld [vmem:[%s2917_s8 + $0x30] sm:$0xff] }
 0x3b2   : > { %1758 = vmatpush.msrb.mxu0 %v1737_v62 }
 0x3b3   : > { %1778 = vmatpush.msrb.mxu1 %v1753_v63 }
 0x3b4   : > { %1759 = vmatpush.msrb.mxu0 %v1736_v0 }
 0x3b5   : > { %1779 = vmatpush.msrb.mxu1 %v1752_v1 }
 0x3b6   : > { %1760 = vmatpush.msrb.mxu0 %v1735_v16 }
 0x3b7   : > { %1780 = vmatpush.msrb.mxu1 %v1751_v17 }
 0x3b8   : > { %1761 = vmatpush.msrb.mxu0 %v1734_v18 }
 0x3b9   : > { %1781 = vmatpush.msrb.mxu1 %v1750_v19 }
 0x3ba   : > { %1762 = vmatpush.msrb.mxu0 %v1733_v21 }
 0x3bb   : > { %1782 = vmatpush.msrb.mxu1 %v1749_v23 }
 0x3bc   : > { %1763 = vmatpush.msrb.mxu0 %v1732_v22 }
 0x3bd   : > { %1783 = vmatpush.msrb.mxu1 %v1748_v24 }
 0x3be   : > { %1764 = vmatpush.msrb.mxu0 %v1731_v25 }
 0x3bf   : > { %1784 = vmatpush.msrb.mxu1 %v1747_v26 }
 0x3c0   : > { %1765 = vmatpush.msrb.mxu0 %v1730_v27 }
 0x3c1   : > { %1785 = vmatpush.msrb.mxu1 %v1746_v29 }
 0x3c2   : > { %1766 = vmatpush.msrb.mxu0 %v1729_v30 }
 0x3c3   : > { %1786 = vmatpush.msrb.mxu1 %v1745_v31 }
 0x3c4   : > { %1767 = vmatpush.msrb.mxu0 %v1728_v32 }
 0x3f8   : > { %v2162_v33 = vpop.permute.xlu0 %2161 }
 0x3f9   : > { %v2164_v34 = vunpack.i.h.bf16 %v2162_v33  ;;  %v2163_v35 = vunpack.i.l.bf16 %v2162_v33  ;;  %v1744_v33 = vld [vmem:[%s2917_s8 + $0xb0] sm:$0xff] }
 0x3fa   : > { %1787 = vmatpush.msrb.mxu1 %v1744_v33 }
 0x3fb   : > { %v1519_v39 = vsel %vm953_vm0, %v2700_v28, %v2164_v34  ;;  %v1514_v40 = vsel %vm953_vm0, %v2696_v20, %v2163_v35  ;;  %v1588_v28 = vperm.slane %v1586_v48, 0  ;;  %v1589_v20 = vperm.slane %v1586_v48, 1  ;;  %v1727_v34 = vld [vmem:[%s2917_s8 + $0x28] sm:$0xff] }
 0x3fc   : > { %v1743_v35 = vld [vmem:[%s2917_s8 + $0xa8] sm:$0xff]  ;;  %1768 = vmatpush.msrb.mxu0 %v1727_v34 }
 0x3fd   : > { %1788 = vmatpush.msrb.mxu1 %v1743_v35 }
 0x402   : > { %v2172_v14 = vpop.permute.xlu0 %2171 }
 0x403   : > { %v2174_v41 = vunpack.i.h.bf16 %v2172_v14  ;;  %v2173_v42 = vunpack.i.l.bf16 %v2172_v14  ;;  %v1726_v14 = vld [vmem:[%s2917_s8 + $0x20] sm:$0xff] }
 0x404   : > { %1769 = vmatpush.msrb.mxu0 %v1726_v14 }
 0x422   : > { %v2167_v36 = vpop.permute.xlu1 %2166 }
 0x423   : > { %v2169_v37 = vunpack.i.h.bf16 %v2167_v36  ;;  %v2168_v38 = vunpack.i.l.bf16 %v2167_v36  ;;  %v1742_v36 = vld [vmem:[%s2917_s8 + $0xa0] sm:$0xff] }
 0x424   : > { %1789 = vmatpush.msrb.mxu1 %v1742_v36 }
 0x425   : > { %v1516_v43 = vsel %vm1515_vm3, %v1514_v40, %v2168_v38  ;;  %v1520_v44 = vsel %vm1515_vm3, %v1519_v39, %v2169_v37  ;;  %v1725_v37 = vld [vmem:[%s2917_s8 + $0x18] sm:$0xff]  ;;  %v1724_v39 = vld [vmem:[%s2917_s8 + $0x10] sm:$0xff] }
 0x426   : > { %v1518_v45 = vsel %vm1517_vm4, %v1516_v43, %v2173_v42  ;;  %v1521_v46 = vsel %vm1517_vm4, %v1520_v44, %v2174_v41  ;;  %v1741_v38 = vld [vmem:[%s2917_s8 + $0x98] sm:$0xff]  ;;  %1770 = vmatpush.msrb.mxu0 %v1725_v37  ;;  %v1740_v40 = vld [vmem:[%s2917_s8 + $0x90] sm:$0xff]  ;;  %v1723_v41 = vld [vmem:[%s2917_s8 + $0x8] sm:$0xff] }
 0x427   : > { %1608 = vmatmul.f32.vlgmr.msra.gmra.mxu0 %v1518_v45  ;;  %1628 = vmatmul.f32.vlgmr.msra.gmra.mxu1 %v1521_v46  ;;  %v1739_v42 = vld [vmem:[%s2917_s8 + $0x88] sm:$0xff]  ;;  %v1722_v43 = vld [vmem:[%s2917_s8] sm:$0xff] }
 0x428   : > { %1648 = vmatmul.f32.vlgmr.msra.gmra.mxu2 %v1518_v45  ;;  %1668 = vmatmul.f32.vlgmr.msra.gmra.mxu3 %v1521_v46  ;;  %v1738_v44 = vld [vmem:[%s2917_s8 + $0x80] sm:$0xff]  ;;  %v1805_v45 = vld [vmem:[%s2919_s10 + $0x30] sm:$0xff]  ;;  %v1806_v46 = vld [vmem:[%s2919_s10 + $0x38] sm:$0xff] }
 0x429   : > { %1790 = vmatpush.msrb.mxu1 %v1741_v38  ;;  %1771 = vmatpush.msrb.mxu0 %v1724_v39 }
 0x42a   : > { %1828 = vmatpush.msrb.mxu2 %v1805_v45  ;;  %1848 = vmatpush.msrb.mxu3 %v1806_v46 }
 0x42b   : > { %1791 = vmatpush.msrb.mxu1 %v1740_v40  ;;  %1772 = vmatpush.msrb.mxu0 %v1723_v41 }
 0x42c   : > { %1829 = vmatpush.msrb.mxu2 %v1803_v3  ;;  %1849 = vmatpush.msrb.mxu3 %v1804_v4 }
 0x42d   : > { %1792 = vmatpush.msrb.mxu1 %v1739_v42  ;;  %1773 = vmatpush.msrb.mxu0 %v1722_v43 }
 0x42e   : > { %1830 = vmatpush.msrb.mxu2 %v1801_v5  ;;  %1850 = vmatpush.msrb.mxu3 %v1802_v6 }
 0x42f   : > { %1793 = vmatpush.msrb.mxu1 %v1738_v44 }
 0x4a4   : > { %v1609_v49 = vpop.f32.mrf.mxu0  ;;  %v1629_v51 = vpop.f32.mrf.mxu1 }
 0x4a5   : > { %v1610_v47 = vadd.f32 %v1609_v49, %v1588_v28 }
 0x4a7   : > { %v1630_v53 = vadd.f32 %v1629_v51, %v1610_v47 }
 0x4a9   : > { %v1672_v58 = vadd.f32 %v2212_v57, %v1630_v53 }
 0x4ab   : > { %v1649_v52 = vpop.f32.mrf.mxu2  ;;  %v1669_v55 = vpop.f32.mrf.mxu3 }
 0x4ac   : > { %v1650_v54 = vadd.f32 %v1649_v52, %v1589_v20 }
 0x4ae   : > { %v1670_v56 = vadd.f32 %v1669_v55, %v1650_v54  ;;  %v1706_v54 = vld [vmem:[%s2915_s6] sm:$0x3] }
 0x4af   : > { %v1708_v57 = vperm.slane %v1706_v54, 0 }
 0x4b0   : > { %v1673_v50 = vadd.f32 %v2213_v59, %v1670_v56  ;;  %v1714_v56 = vld [vmem:[%s2916_s7] sm:$0x3] }
 0x4b1   : > { %v1716_v61 = vperm.slane %v1714_v56, 0  ;;  %v1717_v62 = vperm.slane %v1714_v56, 1 }
 0x4b2   : > { %v1674_v60 = vadd.f32 %v1673_v50, %v1672_v58 }
 0x4b4   : > { %1675 = vadd.xlane.f32.xlu0 %v1674_v60 }
 0x527   : > { %v1676_v9 = vpop.xlane.xlu0 %1675 }
 0x528   : > { %v1684_v8 = vmul.f32 %v2724_v7, %v1676_v9  ;;  %v1800_v9 = vld [vmem:[%s2919_s10 + $0x8] sm:$0xff] }
 0x529   : > { %1851 = vmatpush.msrb.mxu3 %v1800_v9 }
 0x52a   : > { %v2727_v10 = vsub.f32 %v1672_v58, %v1684_v8  ;;  %v2729_v11 = vsub.f32 %v1673_v50, %v1684_v8  ;;  %v1709_v58 = vperm.slane %v1706_v54, 1  ;;  %v2175_v8 = vld [vmem:[%s2918_s9] ss:$0 sm:$0xff] }
 0x52c   : > { %v1687_v12 = vmul.f32 %v2727_v10, %v2727_v10  ;;  %v1688_v13 = vmul.f32 %v2729_v11, %v2729_v11 }
 0x52e   : > { %v1689_v15 = vadd.f32 %v1688_v13, %v1687_v12 }
 0x530   : > { %1690 = vadd.xlane.f32.xlu2 %v1689_v15 }
 0x5a3   : > { %v1691_v48 = vpop.xlane.xlu2 %1690 }
 0x5a4   : > { %v1692_v28 = vmul.f32 %v1691_v48, %v2724_v7  ;;  %v1799_v7 = vld [vmem:[%s2919_s10] sm:$0xff] }
 0x5a5   : > { %1831 = vmatpush.msrb.mxu2 %v1799_v7 }
 0x5a6   : > { %v1693_v49 = vadd.f32 1e-05, %v1692_v28 }
 0x5a8   : > { %2210 = vrsqrt.f32 %v1693_v49  ;;  %vm1700_vm7 = vweird.f32 %v1693_v49 }
 0x5ae   : > { %v2211_v47 = vpop.eup %2210 }
 0x5af   : > { %v1695_v20 = vmul.f32 %v2211_v47, %v1693_v49  ;;  %vm1701_vm6 = vweird.f32 %v2211_v47 }
 0x5b0   : > { %vm1702_vm8 = vmor %vm1700_vm7, %vm1701_vm6 }
 0x5b1   : > { %v1696_v51 = vmul.f32 %v2211_v47, %v1695_v20 }
 0x5b3   : > { %v1697_v52 = vmul.f32 0.5, %v1696_v51 }
 0x5b5   : > { %v1698_v53 = vsub.f32 1.5, %v1697_v52 }
 0x5b7   : > { %v1699_v55 = vmul.f32 %v2211_v47, %v1698_v53 }
 0x5b9   : > { %v1703_v59 = vsel %vm1702_vm8, %v2211_v47, %v1699_v55 }
 0x5ba   : > { %v1704_v50 = vmul.f32 %v1703_v59, %v2727_v10  ;;  %v1705_v60 = vmul.f32 %v1703_v59, %v2729_v11 }
 0x5bc   : > { %v1712_v63 = vmul.f32 %v1708_v57, %v1704_v50  ;;  %v1713_v0 = vmul.f32 %v1709_v58, %v1705_v60 }
 0x5be   : > { %v1720_v1 = vadd.f32 %v1716_v61, %v1712_v63  ;;  %v1721_v2 = vadd.f32 %v1717_v62, %v1713_v0 }
 0x5c0   : > { %1774 = vmatmul.f32.vlgmr.msrb.gmra.mxu0 %v1720_v1  ;;  %1794 = vmatmul.f32.vlgmr.msrb.gmra.mxu1 %v1721_v2 }
 0x63d   : > { %v1775_v10 = vpop.f32.mrf.mxu0  ;;  %v1795_v12 = vpop.f32.mrf.mxu1 }
 0x63e   : > { %v1776_v11 = vadd.f32 %v2175_v8, %v1775_v10 }
 0x640   : > { %v1796_v13 = vadd.f32 %v1795_v12, %v1776_v11 }
 0x642   : > { %v1798_v15 = vmax.f32 %v1796_v13, 0.0 }
 0x644   : > { %2067 = vmatmul.msk.f32.vlgmr.msrb.gmra.mxu2 %vm953_vm0, %v1798_v15  ;;  %2068 = vmatmul.msk.f32.vlgmr.msrb.gmra.mxu3 %vm953_vm0, %v1798_v15 }
 0x645   : > { %2301 = shalt.err (!%p2298_p8)
}
 0x646   : > { %s2388_s23 = smov 128   ;;  %s2389_s24 = smov 8   ;;  %v1807_v16 = vld [vmem:[%s2920_s11] sm:$0x3] }
 0x647   : > { %2089 = dma.vmem_to_hbm [thread:$0]  (%p2498_p5), %s1892_s20, 1024, %s1894_s16, %s1864_s21, %s2388_s23, %s2388_s23, %s2389_s24   ;;  %v1809_v17 = vperm.slane %v1807_v16, 0  ;;  %v1810_v18 = vperm.slane %v1807_v16, 1 }
 0x648   : > { %s2031_s30 = sshll.u32 %s2653_s2, 4  ;;  %s2078_s15 = sshll.u32 %s2481_s29, 4 }
 0x649   : > { %s1875_s22 = scalar_lea.hbm %s2921_s12, %s2078_s15  ;;  %s484_s19 = scalar_lea.vmem [#allocation7], %s2031_s30 }
 0x64a   : > { %s1877_s14 = sshll.u32 %s484_s19, 4  ;;  %s1879_s17 = sshll.u32 %s1875_s22, 4  ;;  %s1878_s14 = int_to_ptr.vmem [resolvable:$true] %s1877_s14  ;;  %s1880_s17 = int_to_ptr.hbm [resolvable:$true] %s1879_s17 }
 0x64b   : > { %s1859_s3 = scalar_lea.sflag [#allocation4], %s2653_s2  ;;  %s2316_s29 = sshra.s32 %s1880_s17, 4  ;;  %s2317_s29 = int_to_ptr.hbm [resolvable:$true] %s2316_s29 }
 0x64c   : > { %s2318_s20 = scalar_lea.hbm %s2317_s29, 16  ;;  %s2322_s23 = scalar_lea.hbm %s2921_s12, 32 }
 0x64d   : > { %p2319_p9 = scmp.ne.s32.totalorder %s2317_s29, %s2318_s20  ;;  %p2323_p12 = scmp.lt.s32.totalorder %s2317_s29, %s2921_s12 }
 0x64e   : > { %p2324_p13 = scmp.lt.s32.totalorder %s2322_s23, %s2318_s20 }
 0x64f   : > { %p2320_p10 = pnand %p2319_p9, %p2498_p5 }
 0x650   : > { %p2325_p0 = por %p2324_p13, %p2323_p12 }
 0x651   : > { %p2321_p11 = pneg %p2320_p10 }
 0x653   : > { %p2326_p1 = pnand %p2325_p0, %p2321_p11 }
 0x6c7   : > { %v1833_v19 = vpop.f32.mrf.mxu2  ;;  %v1853_v21 = vpop.f32.mrf.mxu3 }
 0x6c8   : > { %v1834_v23 = vadd.f32 %v1833_v19, %v1809_v17  ;;  %v1854_v22 = vadd.f32 %v1853_v21, %v1810_v18 }
 0x6ca   : > { %1856 = vst [vmem:[%s484_s19] sm:$0xff] %v1834_v23 }
 0x6cb   : > { %1857 = vst [vmem:[%s484_s19 + $0x8] sm:$0xff] %v1854_v22 }
 0x6cc   : > { %2329 = shalt.err (!%p2326_p1)
}
 0x6cd   : > { %2088 = dma.vmem_to_hbm [thread:$0]  (%p2498_p5), %s1878_s14, 256, %s1880_s17, %s1859_s3  }
 0x6ce PF: > { %p2110_p2 = scmp.ge.s32.totalorder %s2376_s28, 2  ;;  %s1908_s15 = sand.u32 1, %s2364_s25  }
 0x6cf   : > { %s1909_s27 = scalar_lea.sflag [#allocation4], %s1908_s15 }
 0x6d0   : > { %p2100_p3 = pnand %p2110_p2, %p2502_p6 }
 0x6d2   : > { %p2101_p4 = pneg %p2100_p3 }
 0x6d4   : > { %2355 = dma.done.wait (%p2101_p4), %s1909_s27, 256  }
 0x6d5   : > { %2357 = vsyncadd (%p2101_p4), %s1909_s27, 4294967040  ;;  %s1919_s0 = scalar_lea.sflag [#allocation9], %s1908_s15 }
 0x6d6   : > { %2359 = dma.done.wait (%p2101_p4), %s1919_s0, 1024  }
 0x6d7   : > { %2361 = vsyncadd (%p2101_p4), %s1919_s0, 4294966272  ;;  %s2943_s28 = sld [smem:[#allocation15_spill]]  ;;  %s2946_s25 = smov %s2368_s26 }
 0x6d8   : > { %s2944_s1 = sld [smem:[#allocation14_spill]] }
 0x6d9   : > { %s2945_s27 = sld [smem:[#allocation16_spill]] }
 0x6dd   : > { %p29_p5 = scmp.ge.s32.totalorder %s2943_s28, 4  }
 0x6de   : > { %s2947_s26 = smov %s2944_s1 }
 0x6df   :  { %31 = sbr.rel (!%p29_p5) target bundleno = 12 (0xc), region = 139 }
 0x6e4   :  { %1925 = vsyncpa [#allocation3], 1 }
 0x6e5   :  { %1927 = vsyncpa [#allocation3 + $0x1], 1 }
 0x6e6   :  { %1928 = vsyncpa [#allocation6], 1 }
 0x6e7   :  { %1929 = vsyncpa [#allocation4], 1 }
 0x6e8   :  { %1931 = vsyncpa [#allocation4 + $0x1], 1 }
 0x6e9   :  { %1932 = vsyncpa [#allocation9], 1 }
 0x6ea   :  { %1934 = vsyncpa [#allocation9 + $0x1], 1 }

</bundles_post_ra>
